<compile_context>
chip_gen: v5e
topology: v5e:2x2
jax: 0.10.0
libtpu: 0.0.40
codegen_flags: <defaults>
</compile_context>

<pallas_src>
import jax
import jax.numpy as jnp
from jax.experimental import pallas as pl
from jax.experimental.pallas import tpu as pltpu


VMEM_LIMIT = 32 * 1024 * 1024  # explicit scoped-VMEM budget (safe on v5e/v6e/v7x)


def _cp(dim_sem=None):
    if dim_sem is None:
        return pltpu.CompilerParams(vmem_limit_bytes=VMEM_LIMIT)
    return pltpu.CompilerParams(dimension_semantics=dim_sem,
                                vmem_limit_bytes=VMEM_LIMIT)


def _pick_row_tile(M):
    """Row tile for row-parallel GEMM kernels (multiple of 8 if partial)."""
    if M <= 1024:
        return M
    for t in (512, 256, 128, 64, 32, 16, 8):
        if M % t == 0:
            return t
    return M


def _pick_batch_block(B2):
    # v7x megacore: give each TensorCore half the batch when it is big enough.
    if B2 >= 16 and (B2 // 2) % 8 == 0:
        return B2 // 2
    return B2


# ----------------------------------------------------------------------------
# Dual input-gate GEMM: gates = x @ Wih + b for both LSTM directions at once.
# ----------------------------------------------------------------------------
def _dual_gates_kernel(x_ref, wf_ref, bf_ref, wr_ref, br_ref, gf_ref, gr_ref):
    x16 = x_ref[...].astype(jnp.bfloat16)
    gf_ref[...] = jnp.dot(x16, wf_ref[...],
                          preferred_element_type=jnp.float32) + bf_ref[...]
    gr_ref[...] = jnp.dot(x16, wr_ref[...],
                          preferred_element_type=jnp.float32) + br_ref[...]


def dual_gates(x_tm, wih_f, b_f, wih_r, b_r):
    """x_tm: (T, B2, D) time-major. Returns (T, B2, 4H) gates per direction."""
    T, B2, D = x_tm.shape
    G = wih_f.shape[1]
    M = T * B2
    x2 = x_tm.reshape(M, D)
    tm = _pick_row_tile(M)
    grid = (M // tm,)
    gf, gr = pl.pallas_call(
        _dual_gates_kernel,
        out_shape=(jax.ShapeDtypeStruct((M, G), jnp.float32),
                   jax.ShapeDtypeStruct((M, G), jnp.float32)),
        grid=grid,
        in_specs=[
            pl.BlockSpec((tm, D), lambda i: (i, 0)),
            pl.BlockSpec((D, G), lambda i: (0, 0)),
            pl.BlockSpec((1, G), lambda i: (0, 0)),
            pl.BlockSpec((D, G), lambda i: (0, 0)),
            pl.BlockSpec((1, G), lambda i: (0, 0)),
        ],
        out_specs=(pl.BlockSpec((tm, G), lambda i: (i, 0)),
                   pl.BlockSpec((tm, G), lambda i: (i, 0))),
        compiler_params=_cp(("parallel",)),
    )(x2, wih_f.astype(jnp.bfloat16), b_f,
      wih_r.astype(jnp.bfloat16), b_r)
    return gf.reshape(T, B2, G), gr.reshape(T, B2, G)


# ----------------------------------------------------------------------------
# Bidirectional LSTM recurrence: grid (batch_blocks, time), state in VMEM.
# Input projections are precomputed; each step only does h @ Whh.
# ----------------------------------------------------------------------------
def _lstm_step(g_in, m, h_ref, c_ref, whh_ref):
    h_prev = h_ref[...]
    c_prev = c_ref[...]
    gates = g_in + jnp.dot(h_prev.astype(jnp.bfloat16), whh_ref[...],
                           preferred_element_type=jnp.float32)
    # TODO(synk): for production sizes (H not a multiple of 128) a gate-major /
    #             lane-padded weight layout would avoid sub-lane gate slicing.
    H = h_prev.shape[-1]
    i = jax.nn.sigmoid(gates[:, 0:H])
    f = jax.nn.sigmoid(gates[:, H:2 * H])
    g = jnp.tanh(gates[:, 2 * H:3 * H])
    o = jax.nn.sigmoid(gates[:, 3 * H:4 * H])
    c_new = f * c_prev + i * g
    h_new = o * jnp.tanh(c_new)
    keep = m > 0.0                       # (bb, 1) length mask at this timestep
    h_ref[...] = jnp.where(keep, h_new, h_prev)
    c_ref[...] = jnp.where(keep, c_new, c_prev)
    return jnp.where(keep, h_new, 0.0)   # zero output at padded positions


def _bilstm_kernel(gf_ref, gr_ref, mf_ref, mr_ref, whh_f_ref, whh_r_ref,
                   of_ref, or_ref, hf, cf, hr, cr):
    @pl.when(pl.program_id(1) == 0)
    def _():
        hf[...] = jnp.zeros_like(hf)
        cf[...] = jnp.zeros_like(cf)
        hr[...] = jnp.zeros_like(hr)
        cr[...] = jnp.zeros_like(cr)

    of_ref[...] = _lstm_step(gf_ref[...], mf_ref[...], hf, cf, whh_f_ref)
    or_ref[...] = _lstm_step(gr_ref[...], mr_ref[...], hr, cr, whh_r_ref)


def bilstm_time_major(gates_f, gates_r, mask_tm, whh_f, whh_r):
    T, B2, G = gates_f.shape
    H = G // 4
    bb = _pick_batch_block(B2)
    nb = B2 // bb

    fwd = lambda b, t: (t, b, 0)
    rev = lambda b, t: (T - 1 - t, b, 0)
    wmap = lambda b, t: (0, 0)

    out_f, out_r = pl.pallas_call(
        _bilstm_kernel,
        out_shape=(jax.ShapeDtypeStruct((T, B2, H), jnp.float32),
                   jax.ShapeDtypeStruct((T, B2, H), jnp.float32)),
        grid=(nb, T),
        in_specs=[
            pl.BlockSpec((None, bb, G), fwd),    # precomputed gates, forward
            pl.BlockSpec((None, bb, G), rev),    # precomputed gates, reverse
            pl.BlockSpec((None, bb, 1), fwd),    # mask forward
            pl.BlockSpec((None, bb, 1), rev),    # mask reverse
            pl.BlockSpec((H, G), wmap),
            pl.BlockSpec((H, G), wmap),
        ],
        out_specs=(pl.BlockSpec((None, bb, H), fwd),
                   pl.BlockSpec((None, bb, H), rev)),
        scratch_shapes=[pltpu.VMEM((bb, H), jnp.float32)] * 4,
        compiler_params=_cp(("parallel", "arbitrary")),
    )(gates_f, gates_r, mask_tm, mask_tm,
      whh_f.astype(jnp.bfloat16), whh_r.astype(jnp.bfloat16))
    return out_f, out_r


def encode_bilstm(x_bld, mask_bl, params_f, params_r):
    """params_* = (wih, whh, b). Returns (B, L, 2H) batch-major encodings."""
    wih_f, whh_f, b_f = params_f
    wih_r, whh_r, b_r = params_r
    x_tm = jnp.transpose(x_bld, (1, 0, 2))              # (T, B, D)
    m_tm = jnp.transpose(mask_bl, (1, 0))[:, :, None]   # (T, B, 1)
    gf, gr = dual_gates(x_tm, wih_f, b_f, wih_r, b_r)
    of, orr = bilstm_time_major(gf, gr, m_tm, whh_f, whh_r)
    enc = jnp.concatenate([of, orr], axis=-1)            # (T, B, 2H)
    return jnp.transpose(enc, (1, 0, 2))                 # (B, T, 2H)


# ----------------------------------------------------------------------------
# Soft-align attention (batched over a block of samples per grid step).
# ----------------------------------------------------------------------------
def _attention_kernel(p_ref, h_ref, mpc_ref, mhc_ref, mpr_ref, mhr_ref,
                      ap_ref, ah_ref):
    p16 = p_ref[...].astype(jnp.bfloat16)    # (bb, Lp, 2H)
    h16 = h_ref[...].astype(jnp.bfloat16)    # (bb, Lh, 2H)
    sim_ph = jnp.einsum('bpd,bhd->bph', p16, h16,
                        preferred_element_type=jnp.float32)
    # sim_hp == sim_ph^T; recomputed as a cheap MXU matmul to stay on the
    # well-supported batched contraction layout.
    sim_hp = jnp.einsum('bhd,bpd->bhp', h16, p16,
                        preferred_element_type=jnp.float32)
    # TODO(synk): nonzero KB attention (pair_dict) would be added to
    #             sim_ph / sim_hp here; pair_dict=None -> skipped entirely.

    def masked_softmax(logits, mask_row):
        x = jax.nn.softmax(logits * mask_row, axis=-1)
        x = x * mask_row
        return x / (jnp.sum(x, axis=-1, keepdims=True) + 1e-13)

    pa = masked_softmax(sim_ph, mhr_ref[...])    # (bb, Lp, Lh)
    ha = masked_softmax(sim_hp, mpr_ref[...])    # (bb, Lh, Lp)

    ap_ref[...] = (jnp.einsum('bph,bhd->bpd', pa.astype(jnp.bfloat16), h16,
                              preferred_element_type=jnp.float32)
                   * mpc_ref[...])
    ah_ref[...] = (jnp.einsum('bhp,bpd->bhd', ha.astype(jnp.bfloat16), p16,
                              preferred_element_type=jnp.float32)
                   * mhc_ref[...])


def attention(enc_all, mask_all, batch):
    """enc_all: (2B, L, 2H), premises in rows [0,B), hypotheses in [B,2B)."""
    B2, L, Dh = enc_all.shape
    B = batch
    bb = max(d for d in (8, 4, 2, 1) if B % d == 0)
    bb = min(bb, B)
    nblk = B // bb
    hoff = B // bb

    mcol = mask_all[:, :, None]      # (2B, L, 1)
    mrow = mask_all[:, None, :]      # (2B, 1, L)

    pmap = lambda i: (i, 0, 0)
    hmap = lambda i: (hoff + i, 0, 0)

    att_p, att_h = pl.pallas_call(
        _attention_kernel,
        out_shape=(jax.ShapeDtypeStruct((B, L, Dh), jnp.float32),
                   jax.ShapeDtypeStruct((B, L, Dh), jnp.float32)),
        grid=(nblk,),
        in_specs=[
            pl.BlockSpec((bb, L, Dh), pmap),   # premise encodings
            pl.BlockSpec((bb, L, Dh), hmap),   # hypothesis encodings
            pl.BlockSpec((bb, L, 1), pmap),    # premise mask (column form)
            pl.BlockSpec((bb, L, 1), hmap),    # hypothesis mask (column form)
            pl.BlockSpec((bb, 1, L), pmap),    # premise mask (row form)
            pl.BlockSpec((bb, 1, L), hmap),    # hypothesis mask (row form)
        ],
        out_specs=(pl.BlockSpec((bb, L, Dh), pmap),
                   pl.BlockSpec((bb, L, Dh), pmap)),
        compiler_params=_cp(("parallel",)),
    )(enc_all, enc_all, mcol, mcol, mrow, mrow)
    return att_p, att_h


# ----------------------------------------------------------------------------
# Fused enhancement ([enc, att, enc-att, enc*att]) + projection + ReLU.
# relu(enh @ W + b) == relu(enc@(Wa+Wc) + att@(Wb-Wc) + (enc*att)@Wd + b)
# ----------------------------------------------------------------------------
def _enh_proj_kernel(enc_ref, att_ref, wac_ref, wbc_ref, wd_ref, b_ref, out_ref):
    e = enc_ref[...]
    a = att_ref[...]
    y = (jnp.dot(e.astype(jnp.bfloat16), wac_ref[...],
                 preferred_element_type=jnp.float32)
         + jnp.dot(a.astype(jnp.bfloat16), wbc_ref[...],
                   preferred_element_type=jnp.float32)
         + jnp.dot((e * a).astype(jnp.bfloat16), wd_ref[...],
                   preferred_element_type=jnp.float32)
         + b_ref[...])
    out_ref[...] = jnp.maximum(y, 0.0)


def enhance_project(enc_flat, att_flat, proj_w, proj_b):
    M, Dh = enc_flat.shape
    H = proj_w.shape[1]
    wa = proj_w[0:Dh]
    wb = proj_w[Dh:2 * Dh]
    wc = proj_w[2 * Dh:3 * Dh]
    wd = proj_w[3 * Dh:4 * Dh]
    wac = (wa + wc).astype(jnp.bfloat16)
    wbc = (wb - wc).astype(jnp.bfloat16)
    wd16 = wd.astype(jnp.bfloat16)
    tm = _pick_row_tile(M)
    grid = (M // tm,)
    return pl.pallas_call(
        _enh_proj_kernel,
        out_shape=jax.ShapeDtypeStruct((M, H), jnp.float32),
        grid=grid,
        in_specs=[
            pl.BlockSpec((tm, Dh), lambda i: (i, 0)),
            pl.BlockSpec((tm, Dh), lambda i: (i, 0)),
            pl.BlockSpec((Dh, H), lambda i: (0, 0)),
            pl.BlockSpec((Dh, H), lambda i: (0, 0)),
            pl.BlockSpec((Dh, H), lambda i: (0, 0)),
            pl.BlockSpec((1, H), lambda i: (0, 0)),
        ],
        out_specs=pl.BlockSpec((tm, H), lambda i: (i, 0)),
        compiler_params=_cp(("parallel",)),
    )(enc_flat, att_flat, wac, wbc, wd16, proj_b.reshape(1, H))


# ----------------------------------------------------------------------------
# Fused masked avg/max pooling + classification head (Linear-tanh-Linear-softmax).
# Classifier W1 is split per pooled feature so no in-kernel lane concat is needed.
# ----------------------------------------------------------------------------
def _pool_classify_kernel(v_ref, m_ref, w1a_ref, w1b_ref, w1c_ref, w1d_ref,
                          b1_ref, w2_ref, b2_ref, logits_ref, probs_ref):
    v = v_ref[...]            # (2B, L, 2H)
    m = m_ref[...]            # (2B, L, 1)
    avg = jnp.sum(v * m, axis=1) / jnp.sum(m, axis=1)          # (2B, 2H)
    mx = jnp.max(jnp.where(m > 0.0, v, -1e7), axis=1)          # (2B, 2H)
    B = logits_ref.shape[0]

    def mm(x, w_ref):
        return jnp.dot(x.astype(jnp.bfloat16), w_ref[...],
                       preferred_element_type=jnp.float32)

    # v = [v_a_avg, v_a_max, v_b_avg, v_b_max] @ W1  (split by row-block of W1)
    hdn = jnp.tanh(mm(avg[:B], w1a_ref) + mm(mx[:B], w1b_ref)
                   + mm(avg[B:], w1c_ref) + mm(mx[B:], w1d_ref)
                   + b1_ref[...])
    logits = mm(hdn, w2_ref) + b2_ref[...]
    logits_ref[...] = logits
    probs_ref[...] = jax.nn.softmax(logits, axis=-1)


def pool_classify(v_all, mask_all, batch, w1, b1, w2, b2):
    B2, L, Dh = v_all.shape
    H = w2.shape[0]
    C = w2.shape[1]
    w1a = w1[0:Dh]
    w1b = w1[Dh:2 * Dh]
    w1c = w1[2 * Dh:3 * Dh]
    w1d = w1[3 * Dh:4 * Dh]
    to16 = lambda w: w.astype(jnp.bfloat16)
    return pl.pallas_call(
        _pool_classify_kernel,
        out_shape=(jax.ShapeDtypeStruct((batch, C), jnp.float32),
                   jax.ShapeDtypeStruct((batch, C), jnp.float32)),
        compiler_params=_cp(),
    )(v_all, mask_all[:, :, None],
      to16(w1a), to16(w1b), to16(w1c), to16(w1d), b1.reshape(1, H),
      to16(w2), b2.reshape(1, C))


# ----------------------------------------------------------------------------
# Parameter init (deterministic, mirroring _init_esim_weights shapes).
# ----------------------------------------------------------------------------
def xavier_uniform(key, shape, fan_in, fan_out):
    limit = (6.0 / (fan_in + fan_out)) ** 0.5
    return jax.random.uniform(key, shape, jnp.float32, -limit, limit)


def init_lstm_dir(key, input_dim, hidden):
    k1, k2 = jax.random.split(key)
    # stored transposed: x @ wih, h @ whh
    wih = xavier_uniform(k1, (input_dim, 4 * hidden), input_dim, 4 * hidden)
    whh = jax.nn.initializers.orthogonal()(k2, (4 * hidden, hidden),
                                           jnp.float32).T
    b = jnp.zeros((1, 4 * hidden), jnp.float32)
    b = b.at[0, hidden:2 * hidden].set(1.0)   # forget-gate bias_hh = 1
    return wih, whh, b


def init_params(key, vocab_size, embedding_dim, hidden, num_classes):
    ks = jax.random.split(key, 8)
    emb = jax.random.normal(ks[0], (vocab_size, embedding_dim), jnp.float32)
    emb = emb.at[0].set(0.0)                  # padding_idx = 0
    return {
        "emb": emb,
        "enc_f": init_lstm_dir(ks[1], embedding_dim, hidden),
        "enc_r": init_lstm_dir(ks[2], embedding_dim, hidden),
        "comp_f": init_lstm_dir(ks[3], hidden, hidden),
        "comp_r": init_lstm_dir(ks[4], hidden, hidden),
        "proj_w": xavier_uniform(ks[5], (8 * hidden, hidden), 8 * hidden, hidden),
        "proj_b": jnp.zeros((hidden,), jnp.float32),
        "cls_w1": xavier_uniform(ks[6], (8 * hidden, hidden), 8 * hidden, hidden),
        "cls_b1": jnp.zeros((hidden,), jnp.float32),
        "cls_w2": xavier_uniform(ks[7], (hidden, num_classes), hidden, num_classes),
        "cls_b2": jnp.zeros((num_classes,), jnp.float32),
    }


# ----------------------------------------------------------------------------
# Full ESIM forward.
# ----------------------------------------------------------------------------
def esim_forward(params, premises, premises_lengths, hypotheses, hypotheses_lengths):
    del premises_lengths, hypotheses_lengths  # lengths encoded by padding_idx=0
    B, Lp = premises.shape
    Lh = hypotheses.shape[1]
    L = max(Lp, Lh)
    H = params["proj_w"].shape[1]

    # Merge premise + hypothesis into one batch of 2B sequences padded to L so
    # every encoder stage / GEMM runs as a single, larger kernel.
    prem = jnp.pad(premises, ((0, 0), (0, L - Lp)))
    hyp = jnp.pad(hypotheses, ((0, 0), (0, L - Lh)))
    tokens = jnp.concatenate([prem, hyp], axis=0)           # (2B, L)
    # get_mask: positions whose token == padding_idx (0) are masked out.
    mask_all = (tokens != 0).astype(jnp.float32)             # (2B, L)

    emb = jnp.take(params["emb"], tokens, axis=0)             # (2B, L, D)
    # RNNDropout: identity in eval mode.

    enc_all = encode_bilstm(emb, mask_all, params["enc_f"], params["enc_r"])

    att_p, att_h = attention(enc_all, mask_all, B)            # (B, L, 2H) each
    att_all = jnp.concatenate([att_p, att_h], axis=0)         # (2B, L, 2H)

    Dh = enc_all.shape[-1]
    proj_flat = enhance_project(enc_all.reshape(2 * B * L, Dh),
                                att_all.reshape(2 * B * L, Dh),
                                params["proj_w"], params["proj_b"])
    proj_all = proj_flat.reshape(2 * B, L, H)

    v_all = encode_bilstm(proj_all, mask_all, params["comp_f"], params["comp_r"])

    logits, probabilities = pool_classify(v_all, mask_all, B,
                                          params["cls_w1"], params["cls_b1"],
                                          params["cls_w2"], params["cls_b2"])
    return logits, probabilities


# ----------------------------------------------------------------------------
if __name__ == "__main__":
    key = jax.random.PRNGKey(0)
    B, Lp, Lh = 2, 10, 8
    vocab_size, embedding_dim, hidden_size, num_classes = 50, 32, 32, 3

    k_par, k_p, k_h = jax.random.split(key, 3)
    params = init_params(k_par, vocab_size, embedding_dim, hidden_size, num_classes)

    premises_lengths = jnp.array([Lp, 7], jnp.int32)
    hypotheses_lengths = jnp.array([Lh, 5], jnp.int32)
    premises = jax.random.randint(k_p, (B, Lp), 1, vocab_size, jnp.int32)
    hypotheses = jax.random.randint(k_h, (B, Lh), 1, vocab_size, jnp.int32)
    premises = jnp.where(jnp.arange(Lp)[None, :] < premises_lengths[:, None],
                         premises, 0)
    hypotheses = jnp.where(jnp.arange(Lh)[None, :] < hypotheses_lengths[:, None],
                           hypotheses, 0)

    fwd = jax.jit(esim_forward)
    logits, probabilities = fwd(params, premises, premises_lengths,
                                hypotheses, hypotheses_lengths)
    jax.block_until_ready((logits, probabilities))
    assert logits.shape == (B, num_classes)
    assert probabilities.shape == (B, num_classes)
    print("KERNEL_OK")
</pallas_src>

<mosaic_0001>
module attributes {stable_mosaic.version = 11 : i64} {
  func.func @_bilstm_kernel(%arg0: i32, %arg1: i32, %arg2: memref<1x4x128xf32, #tpu.memory_space<vmem>>, %arg3: memref<1x4x128xf32, #tpu.memory_space<vmem>>, %arg4: memref<1x4x1xf32, #tpu.memory_space<vmem>>, %arg5: memref<1x4x1xf32, #tpu.memory_space<vmem>>, %arg6: memref<32x128xbf16, #tpu.memory_space<vmem>>, %arg7: memref<32x128xbf16, #tpu.memory_space<vmem>>, %arg8: memref<1x4x32xf32, #tpu.memory_space<vmem>>, %arg9: memref<1x4x32xf32, #tpu.memory_space<vmem>>, %arg10: memref<4x32xf32, #tpu.memory_space<vmem>>, %arg11: memref<4x32xf32, #tpu.memory_space<vmem>>, %arg12: memref<4x32xf32, #tpu.memory_space<vmem>>, %arg13: memref<4x32xf32, #tpu.memory_space<vmem>>) attributes {dimension_semantics = [#tpu.dimension_semantics<parallel>, #tpu.dimension_semantics<arbitrary>], iteration_bounds = array<i64: 1, 10>, scalar_prefetch = 0 : i64, scratch_operands = 4 : i64, tpu.core_type = #tpu.core_type<tc>, window_params = [{transform_indices = @transform_0, window_bounds = array<i64: 1, 4, 128>}, {transform_indices = @transform_1, window_bounds = array<i64: 1, 4, 128>}, {transform_indices = @transform_2, window_bounds = array<i64: 1, 4, 1>}, {transform_indices = @transform_3, window_bounds = array<i64: 1, 4, 1>}, {pipeline_mode = #tpu.pipeline_mode<synchronous>, transform_indices = @transform_4, window_bounds = array<i64: 32, 128>}, {pipeline_mode = #tpu.pipeline_mode<synchronous>, transform_indices = @transform_5, window_bounds = array<i64: 32, 128>}, {transform_indices = @transform_6, window_bounds = array<i64: 1, 4, 32>}, {transform_indices = @transform_7, window_bounds = array<i64: 1, 4, 32>}]} {
    %c0_i32 = arith.constant 0 : i32
    %0 = arith.cmpi eq, %arg1, %c0_i32 : i32
    %1 = arith.extui %0 : i1 to i32
    %c0_i32_0 = arith.constant 0 : i32
    %2 = arith.cmpi ne, %1, %c0_i32_0 : i32
    scf.if %2 {
      %cst_49 = arith.constant 0.000000e+00 : f32
      %107 = vector.broadcast %cst_49 : f32 to vector<4x32xf32>
      %c0_50 = arith.constant 0 : index
      %c0_51 = arith.constant 0 : index
      %108 = vector.load %arg10[%c0_50, %c0_51] : memref<4x32xf32, #tpu.memory_space<vmem>>, vector<4x32xf32>
      tpu.vector_store %arg10[%c0_50, %c0_51], %107 {strides = array<i32>} : memref<4x32xf32, #tpu.memory_space<vmem>>, vector<4x32xf32>,
      %cst_52 = arith.constant 0.000000e+00 : f32
      %109 = vector.broadcast %cst_52 : f32 to vector<4x32xf32>
      %c0_53 = arith.constant 0 : index
      %c0_54 = arith.constant 0 : index
      %110 = vector.load %arg11[%c0_53, %c0_54] : memref<4x32xf32, #tpu.memory_space<vmem>>, vector<4x32xf32>
      tpu.vector_store %arg11[%c0_53, %c0_54], %109 {strides = array<i32>} : memref<4x32xf32, #tpu.memory_space<vmem>>, vector<4x32xf32>,
      %cst_55 = arith.constant 0.000000e+00 : f32
      %111 = vector.broadcast %cst_55 : f32 to vector<4x32xf32>
      %c0_56 = arith.constant 0 : index
      %c0_57 = arith.constant 0 : index
      %112 = vector.load %arg12[%c0_56, %c0_57] : memref<4x32xf32, #tpu.memory_space<vmem>>, vector<4x32xf32>
      tpu.vector_store %arg12[%c0_56, %c0_57], %111 {strides = array<i32>} : memref<4x32xf32, #tpu.memory_space<vmem>>, vector<4x32xf32>,
      %cst_58 = arith.constant 0.000000e+00 : f32
      %113 = vector.broadcast %cst_58 : f32 to vector<4x32xf32>
      %c0_59 = arith.constant 0 : index
      %c0_60 = arith.constant 0 : index
      %114 = vector.load %arg13[%c0_59, %c0_60] : memref<4x32xf32, #tpu.memory_space<vmem>>, vector<4x32xf32>
      tpu.vector_store %arg13[%c0_59, %c0_60], %113 {strides = array<i32>} : memref<4x32xf32, #tpu.memory_space<vmem>>, vector<4x32xf32>,
    } else {
    }
    %c0 = arith.constant 0 : index
    %c0_1 = arith.constant 0 : index
    %c0_2 = arith.constant 0 : index
    %3 = vector.load %arg2[%c0, %c0_1, %c0_2] : memref<1x4x128xf32, #tpu.memory_space<vmem>>, vector<1x4x128xf32>
    %4 = vector.shape_cast %3 : vector<1x4x128xf32> to vector<4x128xf32>
    %c0_3 = arith.constant 0 : index
    %c0_4 = arith.constant 0 : index
    %c0_5 = arith.constant 0 : index
    %5 = vector.load %arg4[%c0_3, %c0_4, %c0_5] : memref<1x4x1xf32, #tpu.memory_space<vmem>>, vector<1x4x1xf32>
    %6 = vector.shape_cast %5 : vector<1x4x1xf32> to vector<4x1xf32>
    %c0_6 = arith.constant 0 : index
    %c0_7 = arith.constant 0 : index
    %7 = vector.load %arg10[%c0_6, %c0_7] : memref<4x32xf32, #tpu.memory_space<vmem>>, vector<4x32xf32>
    %c0_8 = arith.constant 0 : index
    %c0_9 = arith.constant 0 : index
    %8 = vector.load %arg11[%c0_8, %c0_9] : memref<4x32xf32, #tpu.memory_space<vmem>>, vector<4x32xf32>
    %9 = arith.truncf %7 : vector<4x32xf32> to vector<4x32xbf16>
    %c0_10 = arith.constant 0 : index
    %c0_11 = arith.constant 0 : index
    %10 = vector.load %arg6[%c0_10, %c0_11] : memref<32x128xbf16, #tpu.memory_space<vmem>>, vector<32x128xbf16>
    %cst = arith.constant dense<0.000000e+00> : vector<4x128xf32>
    %11 = tpu.matmul %9, %10, %cst {dimension_numbers = #tpu.dot_dimension_numbers<[1], [0], [0], [1], [0, 0, 1, 1], [], []>} : vector<4x32xbf16>, vector<32x128xbf16>, vector<4x128xf32> -> vector<4x128xf32>
    %12 = arith.addf %4, %11 : vector<4x128xf32>
    %13 = vector.extract_strided_slice %12 {offsets = [0, 0], sizes = [4, 32], strides = [1, 1]} : vector<4x128xf32> to vector<4x32xf32>
    %14 = arith.negf %13 : vector<4x32xf32>
    %15 = math.exp %14 : vector<4x32xf32>
    %cst_12 = arith.constant 1.000000e+00 : f32
    %16 = vector.broadcast %cst_12 : f32 to vector<4x32xf32>
    %17 = arith.addf %16, %15 : vector<4x32xf32>
    %18 = arith.divf %16, %17 : vector<4x32xf32>
    %19 = vector.extract_strided_slice %12 {offsets = [0, 32], sizes = [4, 32], strides = [1, 1]} : vector<4x128xf32> to vector<4x32xf32>
    %20 = arith.negf %19 : vector<4x32xf32>
    %21 = math.exp %20 : vector<4x32xf32>
    %cst_13 = arith.constant 1.000000e+00 : f32
    %22 = vector.broadcast %cst_13 : f32 to vector<4x32xf32>
    %23 = arith.addf %22, %21 : vector<4x32xf32>
    %24 = arith.divf %22, %23 : vector<4x32xf32>
    %25 = vector.extract_strided_slice %12 {offsets = [0, 64], sizes = [4, 32], strides = [1, 1]} : vector<4x128xf32> to vector<4x32xf32>
    %26 = math.tanh %25 : vector<4x32xf32>
    %27 = vector.extract_strided_slice %12 {offsets = [0, 96], sizes = [4, 32], strides = [1, 1]} : vector<4x128xf32> to vector<4x32xf32>
    %28 = arith.negf %27 : vector<4x32xf32>
    %29 = math.exp %28 : vector<4x32xf32>
    %cst_14 = arith.constant 1.000000e+00 : f32
    %30 = vector.broadcast %cst_14 : f32 to vector<4x32xf32>
    %31 = arith.addf %30, %29 : vector<4x32xf32>
    %32 = arith.divf %30, %31 : vector<4x32xf32>
    %33 = arith.mulf %24, %8 : vector<4x32xf32>
    %34 = arith.mulf %18, %26 : vector<4x32xf32>
    %35 = arith.addf %33, %34 : vector<4x32xf32>
    %36 = math.tanh %35 : vector<4x32xf32>
    %37 = arith.mulf %32, %36 : vector<4x32xf32>
    %cst_15 = arith.constant 0.000000e+00 : f32
    %38 = vector.broadcast %cst_15 : f32 to vector<4x1xf32>
    %39 = arith.cmpf ogt, %6, %38 : vector<4x1xf32>
    %40 = vector.shape_cast %39 : vector<4x1xi1> to vector<4x1xi1>
    %41 = vector.broadcast %40 : vector<4x1xi1> to vector<4x32xi1>
    %42 = arith.select %41, %37, %7 : vector<4x32xi1>, vector<4x32xf32>
    %c0_16 = arith.constant 0 : index
    %c0_17 = arith.constant 0 : index
    %43 = vector.load %arg10[%c0_16, %c0_17] : memref<4x32xf32, #tpu.memory_space<vmem>>, vector<4x32xf32>
    tpu.vector_store %arg10[%c0_16, %c0_17], %42 {strides = array<i32>} : memref<4x32xf32, #tpu.memory_space<vmem>>, vector<4x32xf32>,
    %44 = vector.shape_cast %39 : vector<4x1xi1> to vector<4x1xi1>
    %45 = vector.broadcast %44 : vector<4x1xi1> to vector<4x32xi1>
    %46 = arith.select %45, %35, %8 : vector<4x32xi1>, vector<4x32xf32>
    %c0_18 = arith.constant 0 : index
    %c0_19 = arith.constant 0 : index
    %47 = vector.load %arg11[%c0_18, %c0_19] : memref<4x32xf32, #tpu.memory_space<vmem>>, vector<4x32xf32>
    tpu.vector_store %arg11[%c0_18, %c0_19], %46 {strides = array<i32>} : memref<4x32xf32, #tpu.memory_space<vmem>>, vector<4x32xf32>,
    %cst_20 = arith.constant 0.000000e+00 : f32
    %48 = vector.shape_cast %39 : vector<4x1xi1> to vector<4x1xi1>
    %49 = vector.broadcast %48 : vector<4x1xi1> to vector<4x32xi1>
    %50 = vector.broadcast %cst_20 : f32 to vector<4x32xf32>
    %51 = arith.select %49, %37, %50 : vector<4x32xi1>, vector<4x32xf32>
    %c0_21 = arith.constant 0 : index
    %c0_22 = arith.constant 0 : index
    %c0_23 = arith.constant 0 : index
    %52 = vector.load %arg8[%c0_21, %c0_22, %c0_23] : memref<1x4x32xf32, #tpu.memory_space<vmem>>, vector<1x4x32xf32>
    %53 = vector.shape_cast %52 : vector<1x4x32xf32> to vector<4x32xf32>
    %54 = vector.shape_cast %51 : vector<4x32xf32> to vector<1x4x32xf32>
    tpu.vector_store %arg8[%c0_21, %c0_22, %c0_23], %54 {strides = array<i32>} : memref<1x4x32xf32, #tpu.memory_space<vmem>>, vector<1x4x32xf32>,
    %c0_24 = arith.constant 0 : index
    %c0_25 = arith.constant 0 : index
    %c0_26 = arith.constant 0 : index
    %55 = vector.load %arg3[%c0_24, %c0_25, %c0_26] : memref<1x4x128xf32, #tpu.memory_space<vmem>>, vector<1x4x128xf32>
    %56 = vector.shape_cast %55 : vector<1x4x128xf32> to vector<4x128xf32>
    %c0_27 = arith.constant 0 : index
    %c0_28 = arith.constant 0 : index
    %c0_29 = arith.constant 0 : index
    %57 = vector.load %arg5[%c0_27, %c0_28, %c0_29] : memref<1x4x1xf32, #tpu.memory_space<vmem>>, vector<1x4x1xf32>
    %58 = vector.shape_cast %57 : vector<1x4x1xf32> to vector<4x1xf32>
    %c0_30 = arith.constant 0 : index
    %c0_31 = arith.constant 0 : index
    %59 = vector.load %arg12[%c0_30, %c0_31] : memref<4x32xf32, #tpu.memory_space<vmem>>, vector<4x32xf32>
    %c0_32 = arith.constant 0 : index
    %c0_33 = arith.constant 0 : index
    %60 = vector.load %arg13[%c0_32, %c0_33] : memref<4x32xf32, #tpu.memory_space<vmem>>, vector<4x32xf32>
    %61 = arith.truncf %59 : vector<4x32xf32> to vector<4x32xbf16>
    %c0_34 = arith.constant 0 : index
    %c0_35 = arith.constant 0 : index
    %62 = vector.load %arg7[%c0_34, %c0_35] : memref<32x128xbf16, #tpu.memory_space<vmem>>, vector<32x128xbf16>
    %cst_36 = arith.constant dense<0.000000e+00> : vector<4x128xf32>
    %63 = tpu.matmul %61, %62, %cst_36 {dimension_numbers = #tpu.dot_dimension_numbers<[1], [0], [0], [1], [0, 0, 1, 1], [], []>} : vector<4x32xbf16>, vector<32x128xbf16>, vector<4x128xf32> -> vector<4x128xf32>
    %64 = arith.addf %56, %63 : vector<4x128xf32>
    %65 = vector.extract_strided_slice %64 {offsets = [0, 0], sizes = [4, 32], strides = [1, 1]} : vector<4x128xf32> to vector<4x32xf32>
    %66 = arith.negf %65 : vector<4x32xf32>
    %67 = math.exp %66 : vector<4x32xf32>
    %cst_37 = arith.constant 1.000000e+00 : f32
    %68 = vector.broadcast %cst_37 : f32 to vector<4x32xf32>
    %69 = arith.addf %68, %67 : vector<4x32xf32>
    %70 = arith.divf %68, %69 : vector<4x32xf32>
    %71 = vector.extract_strided_slice %64 {offsets = [0, 32], sizes = [4, 32], strides = [1, 1]} : vector<4x128xf32> to vector<4x32xf32>
    %72 = arith.negf %71 : vector<4x32xf32>
    %73 = math.exp %72 : vector<4x32xf32>
    %cst_38 = arith.constant 1.000000e+00 : f32
    %74 = vector.broadcast %cst_38 : f32 to vector<4x32xf32>
    %75 = arith.addf %74, %73 : vector<4x32xf32>
    %76 = arith.divf %74, %75 : vector<4x32xf32>
    %77 = vector.extract_strided_slice %64 {offsets = [0, 64], sizes = [4, 32], strides = [1, 1]} : vector<4x128xf32> to vector<4x32xf32>
    %78 = math.tanh %77 : vector<4x32xf32>
    %79 = vector.extract_strided_slice %64 {offsets = [0, 96], sizes = [4, 32], strides = [1, 1]} : vector<4x128xf32> to vector<4x32xf32>
    %80 = arith.negf %79 : vector<4x32xf32>
    %81 = math.exp %80 : vector<4x32xf32>
    %cst_39 = arith.constant 1.000000e+00 : f32
    %82 = vector.broadcast %cst_39 : f32 to vector<4x32xf32>
    %83 = arith.addf %82, %81 : vector<4x32xf32>
    %84 = arith.divf %82, %83 : vector<4x32xf32>
    %85 = arith.mulf %76, %60 : vector<4x32xf32>
    %86 = arith.mulf %70, %78 : vector<4x32xf32>
    %87 = arith.addf %85, %86 : vector<4x32xf32>
    %88 = math.tanh %87 : vector<4x32xf32>
    %89 = arith.mulf %84, %88 : vector<4x32xf32>
    %cst_40 = arith.constant 0.000000e+00 : f32
    %90 = vector.broadcast %cst_40 : f32 to vector<4x1xf32>
    %91 = arith.cmpf ogt, %58, %90 : vector<4x1xf32>
    %92 = vector.shape_cast %91 : vector<4x1xi1> to vector<4x1xi1>
    %93 = vector.broadcast %92 : vector<4x1xi1> to vector<4x32xi1>
    %94 = arith.select %93, %89, %59 : vector<4x32xi1>, vector<4x32xf32>
    %c0_41 = arith.constant 0 : index
    %c0_42 = arith.constant 0 : index
    %95 = vector.load %arg12[%c0_41, %c0_42] : memref<4x32xf32, #tpu.memory_space<vmem>>, vector<4x32xf32>
    tpu.vector_store %arg12[%c0_41, %c0_42], %94 {strides = array<i32>} : memref<4x32xf32, #tpu.memory_space<vmem>>, vector<4x32xf32>,
    %96 = vector.shape_cast %91 : vector<4x1xi1> to vector<4x1xi1>
    %97 = vector.broadcast %96 : vector<4x1xi1> to vector<4x32xi1>
    %98 = arith.select %97, %87, %60 : vector<4x32xi1>, vector<4x32xf32>
    %c0_43 = arith.constant 0 : index
    %c0_44 = arith.constant 0 : index
    %99 = vector.load %arg13[%c0_43, %c0_44] : memref<4x32xf32, #tpu.memory_space<vmem>>, vector<4x32xf32>
    tpu.vector_store %arg13[%c0_43, %c0_44], %98 {strides = array<i32>} : memref<4x32xf32, #tpu.memory_space<vmem>>, vector<4x32xf32>,
    %cst_45 = arith.constant 0.000000e+00 : f32
    %100 = vector.shape_cast %91 : vector<4x1xi1> to vector<4x1xi1>
    %101 = vector.broadcast %100 : vector<4x1xi1> to vector<4x32xi1>
    %102 = vector.broadcast %cst_45 : f32 to vector<4x32xf32>
    %103 = arith.select %101, %89, %102 : vector<4x32xi1>, vector<4x32xf32>
    %c0_46 = arith.constant 0 : index
    %c0_47 = arith.constant 0 : index
    %c0_48 = arith.constant 0 : index
    %104 = vector.load %arg9[%c0_46, %c0_47, %c0_48] : memref<1x4x32xf32, #tpu.memory_space<vmem>>, vector<1x4x32xf32>
    %105 = vector.shape_cast %104 : vector<1x4x32xf32> to vector<4x32xf32>
    %106 = vector.shape_cast %103 : vector<4x32xf32> to vector<1x4x32xf32>
    tpu.vector_store %arg9[%c0_46, %c0_47, %c0_48], %106 {strides = array<i32>} : memref<1x4x32xf32, #tpu.memory_space<vmem>>, vector<1x4x32xf32>,
    return
  }
  func.func @transform_0(%arg0: i32, %arg1: i32) -> (i32, i32, i32) {
    %c0_i32 = arith.constant 0 : i32
    %c0_i32_0 = arith.constant 0 : i32
    return %arg1, %arg0, %c0_i32 : i32, i32, i32
  }
  func.func @transform_1(%arg0: i32, %arg1: i32) -> (i32, i32, i32) {
    %c9_i32 = arith.constant 9 : i32
    %0 = arith.subi %c9_i32, %arg1 : i32
    %c0_i32 = arith.constant 0 : i32
    %c0_i32_0 = arith.constant 0 : i32
    return %0, %arg0, %c0_i32 : i32, i32, i32
  }
  func.func @transform_2(%arg0: i32, %arg1: i32) -> (i32, i32, i32) {
    %c0_i32 = arith.constant 0 : i32
    %c0_i32_0 = arith.constant 0 : i32
    return %arg1, %arg0, %c0_i32 : i32, i32, i32
  }
  func.func @transform_3(%arg0: i32, %arg1: i32) -> (i32, i32, i32) {
    %c9_i32 = arith.constant 9 : i32
    %0 = arith.subi %c9_i32, %arg1 : i32
    %c0_i32 = arith.constant 0 : i32
    %c0_i32_0 = arith.constant 0 : i32
    return %0, %arg0, %c0_i32 : i32, i32, i32
  }
  func.func @transform_4(%arg0: i32, %arg1: i32) -> (i32, i32) {
    %c0_i32 = arith.constant 0 : i32
    %c0_i32_0 = arith.constant 0 : i32
    %c0_i32_1 = arith.constant 0 : i32
    return %c0_i32, %c0_i32_0 : i32, i32
  }
  func.func @transform_5(%arg0: i32, %arg1: i32) -> (i32, i32) {
    %c0_i32 = arith.constant 0 : i32
    %c0_i32_0 = arith.constant 0 : i32
    %c0_i32_1 = arith.constant 0 : i32
    return %c0_i32, %c0_i32_0 : i32, i32
  }
  func.func @transform_6(%arg0: i32, %arg1: i32) -> (i32, i32, i32) {
    %c0_i32 = arith.constant 0 : i32
    %c0_i32_0 = arith.constant 0 : i32
    return %arg1, %arg0, %c0_i32 : i32, i32, i32
  }
  func.func @transform_7(%arg0: i32, %arg1: i32) -> (i32, i32, i32) {
    %c9_i32 = arith.constant 9 : i32
    %0 = arith.subi %c9_i32, %arg1 : i32
    %c0_i32 = arith.constant 0 : i32
    %c0_i32_0 = arith.constant 0 : i32
    return %0, %arg0, %c0_i32 : i32, i32, i32
  }
}

module attributes {stable_mosaic.version = 11 : i64} {
  func.func @_dual_gates_kernel(%arg0: i32, %arg1: memref<40x32xf32, #tpu.memory_space<vmem>>, %arg2: memref<32x128xbf16, #tpu.memory_space<vmem>>, %arg3: memref<1x128xf32, #tpu.memory_space<vmem>>, %arg4: memref<32x128xbf16, #tpu.memory_space<vmem>>, %arg5: memref<1x128xf32, #tpu.memory_space<vmem>>, %arg6: memref<40x128xf32, #tpu.memory_space<vmem>>, %arg7: memref<40x128xf32, #tpu.memory_space<vmem>>) attributes {dimension_semantics = [#tpu.dimension_semantics<parallel>], iteration_bounds = array<i64: 1>, scalar_prefetch = 0 : i64, scratch_operands = 0 : i64, tpu.core_type = #tpu.core_type<tc>, window_params = [{transform_indices = @transform_0, window_bounds = array<i64: 40, 32>}, {pipeline_mode = #tpu.pipeline_mode<synchronous>, transform_indices = @transform_1, window_bounds = array<i64: 32, 128>}, {pipeline_mode = #tpu.pipeline_mode<synchronous>, transform_indices = @transform_2, window_bounds = array<i64: 1, 128>}, {pipeline_mode = #tpu.pipeline_mode<synchronous>, transform_indices = @transform_3, window_bounds = array<i64: 32, 128>}, {pipeline_mode = #tpu.pipeline_mode<synchronous>, transform_indices = @transform_4, window_bounds = array<i64: 1, 128>}, {transform_indices = @transform_5, window_bounds = array<i64: 40, 128>}, {transform_indices = @transform_6, window_bounds = array<i64: 40, 128>}]} {
    %c0 = arith.constant 0 : index
    %c0_0 = arith.constant 0 : index
    %0 = vector.load %arg1[%c0, %c0_0] : memref<40x32xf32, #tpu.memory_space<vmem>>, vector<40x32xf32>
    %1 = arith.truncf %0 : vector<40x32xf32> to vector<40x32xbf16>
    %c0_1 = arith.constant 0 : index
    %c0_2 = arith.constant 0 : index
    %2 = vector.load %arg2[%c0_1, %c0_2] : memref<32x128xbf16, #tpu.memory_space<vmem>>, vector<32x128xbf16>
    %cst = arith.constant dense<0.000000e+00> : vector<40x128xf32>
    %3 = tpu.matmul %1, %2, %cst {dimension_numbers = #tpu.dot_dimension_numbers<[1], [0], [0], [1], [0, 0, 1, 1], [], []>} : vector<40x32xbf16>, vector<32x128xbf16>, vector<40x128xf32> -> vector<40x128xf32>
    %c0_3 = arith.constant 0 : index
    %c0_4 = arith.constant 0 : index
    %4 = vector.load %arg3[%c0_3, %c0_4] : memref<1x128xf32, #tpu.memory_space<vmem>>, vector<1x128xf32>
    %5 = vector.broadcast %4 : vector<1x128xf32> to vector<40x128xf32>
    %6 = arith.addf %3, %5 : vector<40x128xf32>
    %c0_5 = arith.constant 0 : index
    %c0_6 = arith.constant 0 : index
    %7 = vector.load %arg6[%c0_5, %c0_6] : memref<40x128xf32, #tpu.memory_space<vmem>>, vector<40x128xf32>
    tpu.vector_store %arg6[%c0_5, %c0_6], %6 {strides = array<i32>} : memref<40x128xf32, #tpu.memory_space<vmem>>, vector<40x128xf32>,
    %c0_7 = arith.constant 0 : index
    %c0_8 = arith.constant 0 : index
    %8 = vector.load %arg4[%c0_7, %c0_8] : memref<32x128xbf16, #tpu.memory_space<vmem>>, vector<32x128xbf16>
    %cst_9 = arith.constant dense<0.000000e+00> : vector<40x128xf32>
    %9 = tpu.matmul %1, %8, %cst_9 {dimension_numbers = #tpu.dot_dimension_numbers<[1], [0], [0], [1], [0, 0, 1, 1], [], []>} : vector<40x32xbf16>, vector<32x128xbf16>, vector<40x128xf32> -> vector<40x128xf32>
    %c0_10 = arith.constant 0 : index
    %c0_11 = arith.constant 0 : index
    %10 = vector.load %arg5[%c0_10, %c0_11] : memref<1x128xf32, #tpu.memory_space<vmem>>, vector<1x128xf32>
    %11 = vector.broadcast %10 : vector<1x128xf32> to vector<40x128xf32>
    %12 = arith.addf %9, %11 : vector<40x128xf32>
    %c0_12 = arith.constant 0 : index
    %c0_13 = arith.constant 0 : index
    %13 = vector.load %arg7[%c0_12, %c0_13] : memref<40x128xf32, #tpu.memory_space<vmem>>, vector<40x128xf32>
    tpu.vector_store %arg7[%c0_12, %c0_13], %12 {strides = array<i32>} : memref<40x128xf32, #tpu.memory_space<vmem>>, vector<40x128xf32>,
    return
  }
  func.func @transform_0(%arg0: i32) -> (i32, i32) {
    %c0_i32 = arith.constant 0 : i32
    %c0_i32_0 = arith.constant 0 : i32
    return %arg0, %c0_i32 : i32, i32
  }
  func.func @transform_1(%arg0: i32) -> (i32, i32) {
    %c0_i32 = arith.constant 0 : i32
    %c0_i32_0 = arith.constant 0 : i32
    %c0_i32_1 = arith.constant 0 : i32
    return %c0_i32, %c0_i32_0 : i32, i32
  }
  func.func @transform_2(%arg0: i32) -> (i32, i32) {
    %c0_i32 = arith.constant 0 : i32
    %c0_i32_0 = arith.constant 0 : i32
    %c0_i32_1 = arith.constant 0 : i32
    return %c0_i32, %c0_i32_0 : i32, i32
  }
  func.func @transform_3(%arg0: i32) -> (i32, i32) {
    %c0_i32 = arith.constant 0 : i32
    %c0_i32_0 = arith.constant 0 : i32
    %c0_i32_1 = arith.constant 0 : i32
    return %c0_i32, %c0_i32_0 : i32, i32
  }
  func.func @transform_4(%arg0: i32) -> (i32, i32) {
    %c0_i32 = arith.constant 0 : i32
    %c0_i32_0 = arith.constant 0 : i32
    %c0_i32_1 = arith.constant 0 : i32
    return %c0_i32, %c0_i32_0 : i32, i32
  }
  func.func @transform_5(%arg0: i32) -> (i32, i32) {
    %c0_i32 = arith.constant 0 : i32
    %c0_i32_0 = arith.constant 0 : i32
    return %arg0, %c0_i32 : i32, i32
  }
  func.func @transform_6(%arg0: i32) -> (i32, i32) {
    %c0_i32 = arith.constant 0 : i32
    %c0_i32_0 = arith.constant 0 : i32
    return %arg0, %c0_i32 : i32, i32
  }
}

module attributes {stable_mosaic.version = 11 : i64} {
  func.func @_attention_kernel(%arg0: i32, %arg1: memref<2x10x64xf32, #tpu.memory_space<vmem>>, %arg2: memref<2x10x64xf32, #tpu.memory_space<vmem>>, %arg3: memref<2x10x1xf32, #tpu.memory_space<vmem>>, %arg4: memref<2x10x1xf32, #tpu.memory_space<vmem>>, %arg5: memref<2x1x10xf32, #tpu.memory_space<vmem>>, %arg6: memref<2x1x10xf32, #tpu.memory_space<vmem>>, %arg7: memref<2x10x64xf32, #tpu.memory_space<vmem>>, %arg8: memref<2x10x64xf32, #tpu.memory_space<vmem>>) attributes {dimension_semantics = [#tpu.dimension_semantics<parallel>], iteration_bounds = array<i64: 1>, scalar_prefetch = 0 : i64, scratch_operands = 0 : i64, tpu.core_type = #tpu.core_type<tc>, window_params = [{transform_indices = @transform_0, window_bounds = array<i64: 2, 10, 64>}, {transform_indices = @transform_1, window_bounds = array<i64: 2, 10, 64>}, {transform_indices = @transform_2, window_bounds = array<i64: 2, 10, 1>}, {transform_indices = @transform_3, window_bounds = array<i64: 2, 10, 1>}, {transform_indices = @transform_4, window_bounds = array<i64: 2, 1, 10>}, {transform_indices = @transform_5, window_bounds = array<i64: 2, 1, 10>}, {transform_indices = @transform_6, window_bounds = array<i64: 2, 10, 64>}, {transform_indices = @transform_7, window_bounds = array<i64: 2, 10, 64>}]} {
    %c0 = arith.constant 0 : index
    %c0_0 = arith.constant 0 : index
    %c0_1 = arith.constant 0 : index
    %0 = vector.load %arg1[%c0, %c0_0, %c0_1] : memref<2x10x64xf32, #tpu.memory_space<vmem>>, vector<2x10x64xf32>
    %1 = arith.truncf %0 : vector<2x10x64xf32> to vector<2x10x64xbf16>
    %c0_2 = arith.constant 0 : index
    %c0_3 = arith.constant 0 : index
    %c0_4 = arith.constant 0 : index
    %2 = vector.load %arg2[%c0_2, %c0_3, %c0_4] : memref<2x10x64xf32, #tpu.memory_space<vmem>>, vector<2x10x64xf32>
    %3 = arith.truncf %2 : vector<2x10x64xf32> to vector<2x10x64xbf16>
    "tpu.trace_start"() <{level = 10 : i32, message = "bpd,bhd->bph"}> : () -> ()
    %cst = arith.constant dense<0.000000e+00> : vector<2x10x10xf32>
    %4 = tpu.matmul %1, %3, %cst {dimension_numbers = #tpu.dot_dimension_numbers<[2], [2], [1], [1], [0, 0, 0, 1, 1, 1], [0], [0]>} : vector<2x10x64xbf16>, vector<2x10x64xbf16>, vector<2x10x10xf32> -> vector<2x10x10xf32>
    "tpu.trace_stop"() : () -> ()
    "tpu.trace_start"() <{level = 10 : i32, message = "bhd,bpd->bhp"}> : () -> ()
    %cst_5 = arith.constant dense<0.000000e+00> : vector<2x10x10xf32>
    %5 = tpu.matmul %3, %1, %cst_5 {dimension_numbers = #tpu.dot_dimension_numbers<[2], [2], [1], [1], [0, 0, 0, 1, 1, 1], [0], [0]>} : vector<2x10x64xbf16>, vector<2x10x64xbf16>, vector<2x10x10xf32> -> vector<2x10x10xf32>
    "tpu.trace_stop"() : () -> ()
    %c0_6 = arith.constant 0 : index
    %c0_7 = arith.constant 0 : index
    %c0_8 = arith.constant 0 : index
    %6 = vector.load %arg6[%c0_6, %c0_7, %c0_8] : memref<2x1x10xf32, #tpu.memory_space<vmem>>, vector<2x1x10xf32>
    %7 = vector.broadcast %6 : vector<2x1x10xf32> to vector<2x10x10xf32>
    %8 = arith.mulf %4, %7 : vector<2x10x10xf32>
    %cst_9 = arith.constant dense<0xFF800000> : vector<2x10xf32>
    %9 = vector.multi_reduction <maximumf>, %8, %cst_9 [2] : vector<2x10x10xf32> to vector<2x10xf32>
    %cst_10 = arith.constant 0xFF800000 : f32
    %10 = vector.broadcast %cst_10 : f32 to vector<2x10xf32>
    %11 = arith.maximumf %10, %9 : vector<2x10xf32>
    %12 = vector.shape_cast %11 : vector<2x10xf32> to vector<2x10x1xf32>
    %13 = vector.broadcast %12 : vector<2x10x1xf32> to vector<2x10x10xf32>
    %14 = arith.subf %8, %13 : vector<2x10x10xf32>
    %15 = math.exp %14 : vector<2x10x10xf32>
    %cst_11 = arith.constant dense<0.000000e+00> : vector<2x10xf32>
    %16 = vector.multi_reduction <add>, %15, %cst_11 [2] : vector<2x10x10xf32> to vector<2x10xf32>
    %17 = vector.shape_cast %16 : vector<2x10xf32> to vector<2x10x1xf32>
    %18 = vector.broadcast %17 : vector<2x10x1xf32> to vector<2x10x10xf32>
    %19 = arith.divf %15, %18 : vector<2x10x10xf32>
    %20 = vector.broadcast %6 : vector<2x1x10xf32> to vector<2x10x10xf32>
    %21 = arith.mulf %19, %20 : vector<2x10x10xf32>
    %cst_12 = arith.constant dense<0.000000e+00> : vector<2x10xf32>
    %22 = vector.multi_reduction <add>, %21, %cst_12 [2] : vector<2x10x10xf32> to vector<2x10xf32>
    %23 = vector.shape_cast %22 : vector<2x10xf32> to vector<2x10x1xf32>
    %cst_13 = arith.constant 9.99999982E-14 : f32
    %24 = vector.broadcast %cst_13 : f32 to vector<2x10x1xf32>
    %25 = arith.addf %23, %24 : vector<2x10x1xf32>
    %26 = vector.broadcast %25 : vector<2x10x1xf32> to vector<2x10x10xf32>
    %27 = arith.divf %21, %26 : vector<2x10x10xf32>
    %c0_14 = arith.constant 0 : index
    %c0_15 = arith.constant 0 : index
    %c0_16 = arith.constant 0 : index
    %28 = vector.load %arg5[%c0_14, %c0_15, %c0_16] : memref<2x1x10xf32, #tpu.memory_space<vmem>>, vector<2x1x10xf32>
    %29 = vector.broadcast %28 : vector<2x1x10xf32> to vector<2x10x10xf32>
    %30 = arith.mulf %5, %29 : vector<2x10x10xf32>
    %cst_17 = arith.constant dense<0xFF800000> : vector<2x10xf32>
    %31 = vector.multi_reduction <maximumf>, %30, %cst_17 [2] : vector<2x10x10xf32> to vector<2x10xf32>
    %cst_18 = arith.constant 0xFF800000 : f32
    %32 = vector.broadcast %cst_18 : f32 to vector<2x10xf32>
    %33 = arith.maximumf %32, %31 : vector<2x10xf32>
    %34 = vector.shape_cast %33 : vector<2x10xf32> to vector<2x10x1xf32>
    %35 = vector.broadcast %34 : vector<2x10x1xf32> to vector<2x10x10xf32>
    %36 = arith.subf %30, %35 : vector<2x10x10xf32>
    %37 = math.exp %36 : vector<2x10x10xf32>
    %cst_19 = arith.constant dense<0.000000e+00> : vector<2x10xf32>
    %38 = vector.multi_reduction <add>, %37, %cst_19 [2] : vector<2x10x10xf32> to vector<2x10xf32>
    %39 = vector.shape_cast %38 : vector<2x10xf32> to vector<2x10x1xf32>
    %40 = vector.broadcast %39 : vector<2x10x1xf32> to vector<2x10x10xf32>
    %41 = arith.divf %37, %40 : vector<2x10x10xf32>
    %42 = vector.broadcast %28 : vector<2x1x10xf32> to vector<2x10x10xf32>
    %43 = arith.mulf %41, %42 : vector<2x10x10xf32>
    %cst_20 = arith.constant dense<0.000000e+00> : vector<2x10xf32>
    %44 = vector.multi_reduction <add>, %43, %cst_20 [2] : vector<2x10x10xf32> to vector<2x10xf32>
    %45 = vector.shape_cast %44 : vector<2x10xf32> to vector<2x10x1xf32>
    %cst_21 = arith.constant 9.99999982E-14 : f32
    %46 = vector.broadcast %cst_21 : f32 to vector<2x10x1xf32>
    %47 = arith.addf %45, %46 : vector<2x10x1xf32>
    %48 = vector.broadcast %47 : vector<2x10x1xf32> to vector<2x10x10xf32>
    %49 = arith.divf %43, %48 : vector<2x10x10xf32>
    %50 = arith.truncf %27 : vector<2x10x10xf32> to vector<2x10x10xbf16>
    "tpu.trace_start"() <{level = 10 : i32, message = "bph,bhd->bpd"}> : () -> ()
    %cst_22 = arith.constant dense<0.000000e+00> : vector<2x10x64xf32>
    %51 = tpu.matmul %50, %3, %cst_22 {dimension_numbers = #tpu.dot_dimension_numbers<[2], [1], [1], [2], [0, 0, 0, 1, 1, 2], [0], [0]>} : vector<2x10x10xbf16>, vector<2x10x64xbf16>, vector<2x10x64xf32> -> vector<2x10x64xf32>
    "tpu.trace_stop"() : () -> ()
    %c0_23 = arith.constant 0 : index
    %c0_24 = arith.constant 0 : index
    %c0_25 = arith.constant 0 : index
    %52 = vector.load %arg3[%c0_23, %c0_24, %c0_25] : memref<2x10x1xf32, #tpu.memory_space<vmem>>, vector<2x10x1xf32>
    %53 = vector.broadcast %52 : vector<2x10x1xf32> to vector<2x10x64xf32>
    %54 = arith.mulf %51, %53 : vector<2x10x64xf32>
    %c0_26 = arith.constant 0 : index
    %c0_27 = arith.constant 0 : index
    %c0_28 = arith.constant 0 : index
    %55 = vector.load %arg7[%c0_26, %c0_27, %c0_28] : memref<2x10x64xf32, #tpu.memory_space<vmem>>, vector<2x10x64xf32>
    tpu.vector_store %arg7[%c0_26, %c0_27, %c0_28], %54 {strides = array<i32>} : memref<2x10x64xf32, #tpu.memory_space<vmem>>, vector<2x10x64xf32>,
    %56 = arith.truncf %49 : vector<2x10x10xf32> to vector<2x10x10xbf16>
    "tpu.trace_start"() <{level = 10 : i32, message = "bhp,bpd->bhd"}> : () -> ()
    %cst_29 = arith.constant dense<0.000000e+00> : vector<2x10x64xf32>
    %57 = tpu.matmul %56, %1, %cst_29 {dimension_numbers = #tpu.dot_dimension_numbers<[2], [1], [1], [2], [0, 0, 0, 1, 1, 2], [0], [0]>} : vector<2x10x10xbf16>, vector<2x10x64xbf16>, vector<2x10x64xf32> -> vector<2x10x64xf32>
    "tpu.trace_stop"() : () -> ()
    %c0_30 = arith.constant 0 : index
    %c0_31 = arith.constant 0 : index
    %c0_32 = arith.constant 0 : index
    %58 = vector.load %arg4[%c0_30, %c0_31, %c0_32] : memref<2x10x1xf32, #tpu.memory_space<vmem>>, vector<2x10x1xf32>
    %59 = vector.broadcast %58 : vector<2x10x1xf32> to vector<2x10x64xf32>
    %60 = arith.mulf %57, %59 : vector<2x10x64xf32>
    %c0_33 = arith.constant 0 : index
    %c0_34 = arith.constant 0 : index
    %c0_35 = arith.constant 0 : index
    %61 = vector.load %arg8[%c0_33, %c0_34, %c0_35] : memref<2x10x64xf32, #tpu.memory_space<vmem>>, vector<2x10x64xf32>
    tpu.vector_store %arg8[%c0_33, %c0_34, %c0_35], %60 {strides = array<i32>} : memref<2x10x64xf32, #tpu.memory_space<vmem>>, vector<2x10x64xf32>,
    return
  }
  func.func @transform_0(%arg0: i32) -> (i32, i32, i32) {
    %c0_i32 = arith.constant 0 : i32
    %c0_i32_0 = arith.constant 0 : i32
    %c0_i32_1 = arith.constant 0 : i32
    return %arg0, %c0_i32, %c0_i32_0 : i32, i32, i32
  }
  func.func @transform_1(%arg0: i32) -> (i32, i32, i32) {
    %c1_i32 = arith.constant 1 : i32
    %0 = arith.addi %c1_i32, %arg0 : i32
    %c0_i32 = arith.constant 0 : i32
    %c0_i32_0 = arith.constant 0 : i32
    %c0_i32_1 = arith.constant 0 : i32
    return %0, %c0_i32, %c0_i32_0 : i32, i32, i32
  }
  func.func @transform_2(%arg0: i32) -> (i32, i32, i32) {
    %c0_i32 = arith.constant 0 : i32
    %c0_i32_0 = arith.constant 0 : i32
    %c0_i32_1 = arith.constant 0 : i32
    return %arg0, %c0_i32, %c0_i32_0 : i32, i32, i32
  }
  func.func @transform_3(%arg0: i32) -> (i32, i32, i32) {
    %c1_i32 = arith.constant 1 : i32
    %0 = arith.addi %c1_i32, %arg0 : i32
    %c0_i32 = arith.constant 0 : i32
    %c0_i32_0 = arith.constant 0 : i32
    %c0_i32_1 = arith.constant 0 : i32
    return %0, %c0_i32, %c0_i32_0 : i32, i32, i32
  }
  func.func @transform_4(%arg0: i32) -> (i32, i32, i32) {
    %c0_i32 = arith.constant 0 : i32
    %c0_i32_0 = arith.constant 0 : i32
    %c0_i32_1 = arith.constant 0 : i32
    return %arg0, %c0_i32, %c0_i32_0 : i32, i32, i32
  }
  func.func @transform_5(%arg0: i32) -> (i32, i32, i32) {
    %c1_i32 = arith.constant 1 : i32
    %0 = arith.addi %c1_i32, %arg0 : i32
    %c0_i32 = arith.constant 0 : i32
    %c0_i32_0 = arith.constant 0 : i32
    %c0_i32_1 = arith.constant 0 : i32
    return %0, %c0_i32, %c0_i32_0 : i32, i32, i32
  }
  func.func @transform_6(%arg0: i32) -> (i32, i32, i32) {
    %c0_i32 = arith.constant 0 : i32
    %c0_i32_0 = arith.constant 0 : i32
    %c0_i32_1 = arith.constant 0 : i32
    return %arg0, %c0_i32, %c0_i32_0 : i32, i32, i32
  }
  func.func @transform_7(%arg0: i32) -> (i32, i32, i32) {
    %c0_i32 = arith.constant 0 : i32
    %c0_i32_0 = arith.constant 0 : i32
    %c0_i32_1 = arith.constant 0 : i32
    return %arg0, %c0_i32, %c0_i32_0 : i32, i32, i32
  }
}

module attributes {stable_mosaic.version = 11 : i64} {
  func.func @_enh_proj_kernel(%arg0: i32, %arg1: memref<40x64xf32, #tpu.memory_space<vmem>>, %arg2: memref<40x64xf32, #tpu.memory_space<vmem>>, %arg3: memref<64x32xbf16, #tpu.memory_space<vmem>>, %arg4: memref<64x32xbf16, #tpu.memory_space<vmem>>, %arg5: memref<64x32xbf16, #tpu.memory_space<vmem>>, %arg6: memref<1x32xf32, #tpu.memory_space<vmem>>, %arg7: memref<40x32xf32, #tpu.memory_space<vmem>>) attributes {dimension_semantics = [#tpu.dimension_semantics<parallel>], iteration_bounds = array<i64: 1>, scalar_prefetch = 0 : i64, scratch_operands = 0 : i64, tpu.core_type = #tpu.core_type<tc>, window_params = [{transform_indices = @transform_0, window_bounds = array<i64: 40, 64>}, {transform_indices = @transform_1, window_bounds = array<i64: 40, 64>}, {pipeline_mode = #tpu.pipeline_mode<synchronous>, transform_indices = @transform_2, window_bounds = array<i64: 64, 32>}, {pipeline_mode = #tpu.pipeline_mode<synchronous>, transform_indices = @transform_3, window_bounds = array<i64: 64, 32>}, {pipeline_mode = #tpu.pipeline_mode<synchronous>, transform_indices = @transform_4, window_bounds = array<i64: 64, 32>}, {pipeline_mode = #tpu.pipeline_mode<synchronous>, transform_indices = @transform_5, window_bounds = array<i64: 1, 32>}, {transform_indices = @transform_6, window_bounds = array<i64: 40, 32>}]} {
    %c0 = arith.constant 0 : index
    %c0_0 = arith.constant 0 : index
    %0 = vector.load %arg1[%c0, %c0_0] : memref<40x64xf32, #tpu.memory_space<vmem>>, vector<40x64xf32>
    %c0_1 = arith.constant 0 : index
    %c0_2 = arith.constant 0 : index
    %1 = vector.load %arg2[%c0_1, %c0_2] : memref<40x64xf32, #tpu.memory_space<vmem>>, vector<40x64xf32>
    %2 = arith.truncf %0 : vector<40x64xf32> to vector<40x64xbf16>
    %c0_3 = arith.constant 0 : index
    %c0_4 = arith.constant 0 : index
    %3 = vector.load %arg3[%c0_3, %c0_4] : memref<64x32xbf16, #tpu.memory_space<vmem>>, vector<64x32xbf16>
    %cst = arith.constant dense<0.000000e+00> : vector<40x32xf32>
    %4 = tpu.matmul %2, %3, %cst {dimension_numbers = #tpu.dot_dimension_numbers<[1], [0], [0], [1], [0, 0, 1, 1], [], []>} : vector<40x64xbf16>, vector<64x32xbf16>, vector<40x32xf32> -> vector<40x32xf32>
    %5 = arith.truncf %1 : vector<40x64xf32> to vector<40x64xbf16>
    %c0_5 = arith.constant 0 : index
    %c0_6 = arith.constant 0 : index
    %6 = vector.load %arg4[%c0_5, %c0_6] : memref<64x32xbf16, #tpu.memory_space<vmem>>, vector<64x32xbf16>
    %cst_7 = arith.constant dense<0.000000e+00> : vector<40x32xf32>
    %7 = tpu.matmul %5, %6, %cst_7 {dimension_numbers = #tpu.dot_dimension_numbers<[1], [0], [0], [1], [0, 0, 1, 1], [], []>} : vector<40x64xbf16>, vector<64x32xbf16>, vector<40x32xf32> -> vector<40x32xf32>
    %8 = arith.addf %4, %7 : vector<40x32xf32>
    %9 = arith.mulf %0, %1 : vector<40x64xf32>
    %10 = arith.truncf %9 : vector<40x64xf32> to vector<40x64xbf16>
    %c0_8 = arith.constant 0 : index
    %c0_9 = arith.constant 0 : index
    %11 = vector.load %arg5[%c0_8, %c0_9] : memref<64x32xbf16, #tpu.memory_space<vmem>>, vector<64x32xbf16>
    %cst_10 = arith.constant dense<0.000000e+00> : vector<40x32xf32>
    %12 = tpu.matmul %10, %11, %cst_10 {dimension_numbers = #tpu.dot_dimension_numbers<[1], [0], [0], [1], [0, 0, 1, 1], [], []>} : vector<40x64xbf16>, vector<64x32xbf16>, vector<40x32xf32> -> vector<40x32xf32>
    %13 = arith.addf %8, %12 : vector<40x32xf32>
    %c0_11 = arith.constant 0 : index
    %c0_12 = arith.constant 0 : index
    %14 = vector.load %arg6[%c0_11, %c0_12] : memref<1x32xf32, #tpu.memory_space<vmem>>, vector<1x32xf32>
    %15 = vector.broadcast %14 : vector<1x32xf32> to vector<40x32xf32>
    %16 = arith.addf %13, %15 : vector<40x32xf32>
    %cst_13 = arith.constant 0.000000e+00 : f32
    %17 = vector.broadcast %cst_13 : f32 to vector<40x32xf32>
    %18 = arith.maximumf %16, %17 : vector<40x32xf32>
    %c0_14 = arith.constant 0 : index
    %c0_15 = arith.constant 0 : index
    %19 = vector.load %arg7[%c0_14, %c0_15] : memref<40x32xf32, #tpu.memory_space<vmem>>, vector<40x32xf32>
    tpu.vector_store %arg7[%c0_14, %c0_15], %18 {strides = array<i32>} : memref<40x32xf32, #tpu.memory_space<vmem>>, vector<40x32xf32>,
    return
  }
  func.func @transform_0(%arg0: i32) -> (i32, i32) {
    %c0_i32 = arith.constant 0 : i32
    %c0_i32_0 = arith.constant 0 : i32
    return %arg0, %c0_i32 : i32, i32
  }
  func.func @transform_1(%arg0: i32) -> (i32, i32) {
    %c0_i32 = arith.constant 0 : i32
    %c0_i32_0 = arith.constant 0 : i32
    return %arg0, %c0_i32 : i32, i32
  }
  func.func @transform_2(%arg0: i32) -> (i32, i32) {
    %c0_i32 = arith.constant 0 : i32
    %c0_i32_0 = arith.constant 0 : i32
    %c0_i32_1 = arith.constant 0 : i32
    return %c0_i32, %c0_i32_0 : i32, i32
  }
  func.func @transform_3(%arg0: i32) -> (i32, i32) {
    %c0_i32 = arith.constant 0 : i32
    %c0_i32_0 = arith.constant 0 : i32
    %c0_i32_1 = arith.constant 0 : i32
    return %c0_i32, %c0_i32_0 : i32, i32
  }
  func.func @transform_4(%arg0: i32) -> (i32, i32) {
    %c0_i32 = arith.constant 0 : i32
    %c0_i32_0 = arith.constant 0 : i32
    %c0_i32_1 = arith.constant 0 : i32
    return %c0_i32, %c0_i32_0 : i32, i32
  }
  func.func @transform_5(%arg0: i32) -> (i32, i32) {
    %c0_i32 = arith.constant 0 : i32
    %c0_i32_0 = arith.constant 0 : i32
    %c0_i32_1 = arith.constant 0 : i32
    return %c0_i32, %c0_i32_0 : i32, i32
  }
  func.func @transform_6(%arg0: i32) -> (i32, i32) {
    %c0_i32 = arith.constant 0 : i32
    %c0_i32_0 = arith.constant 0 : i32
    return %arg0, %c0_i32 : i32, i32
  }
}

module attributes {stable_mosaic.version = 11 : i64} {
  func.func @_pool_classify_kernel(%arg0: memref<4x10x64xf32, #tpu.memory_space<vmem>>, %arg1: memref<4x10x1xf32, #tpu.memory_space<vmem>>, %arg2: memref<64x32xbf16, #tpu.memory_space<vmem>>, %arg3: memref<64x32xbf16, #tpu.memory_space<vmem>>, %arg4: memref<64x32xbf16, #tpu.memory_space<vmem>>, %arg5: memref<64x32xbf16, #tpu.memory_space<vmem>>, %arg6: memref<1x32xf32, #tpu.memory_space<vmem>>, %arg7: memref<32x3xbf16, #tpu.memory_space<vmem>>, %arg8: memref<1x3xf32, #tpu.memory_space<vmem>>, %arg9: memref<2x3xf32, #tpu.memory_space<vmem>>, %arg10: memref<2x3xf32, #tpu.memory_space<vmem>>) attributes {dimension_semantics = [], scalar_prefetch = 0 : i64, scratch_operands = 0 : i64, tpu.core_type = #tpu.core_type<tc>} {
    %c0 = arith.constant 0 : index
    %c0_0 = arith.constant 0 : index
    %c0_1 = arith.constant 0 : index
    %0 = vector.load %arg0[%c0, %c0_0, %c0_1] : memref<4x10x64xf32, #tpu.memory_space<vmem>>, vector<4x10x64xf32>
    %c0_2 = arith.constant 0 : index
    %c0_3 = arith.constant 0 : index
    %c0_4 = arith.constant 0 : index
    %1 = vector.load %arg1[%c0_2, %c0_3, %c0_4] : memref<4x10x1xf32, #tpu.memory_space<vmem>>, vector<4x10x1xf32>
    %2 = vector.broadcast %1 : vector<4x10x1xf32> to vector<4x10x64xf32>
    %3 = arith.mulf %0, %2 : vector<4x10x64xf32>
    %cst = arith.constant dense<0.000000e+00> : vector<4x64xf32>
    %4 = vector.multi_reduction <add>, %3, %cst [1] : vector<4x10x64xf32> to vector<4x64xf32>
    %cst_5 = arith.constant dense<0.000000e+00> : vector<4x1xf32>
    %5 = vector.multi_reduction <add>, %1, %cst_5 [1] : vector<4x10x1xf32> to vector<4x1xf32>
    %6 = vector.broadcast %5 : vector<4x1xf32> to vector<4x64xf32>
    %7 = arith.divf %4, %6 : vector<4x64xf32>
    %cst_6 = arith.constant 0.000000e+00 : f32
    %8 = vector.broadcast %cst_6 : f32 to vector<4x10x1xf32>
    %9 = arith.cmpf ogt, %1, %8 : vector<4x10x1xf32>
    %cst_7 = arith.constant -1.000000e+07 : f32
    %10 = vector.shape_cast %9 : vector<4x10x1xi1> to vector<4x10x1xi1>
    %11 = vector.broadcast %10 : vector<4x10x1xi1> to vector<4x10x64xi1>
    %12 = vector.broadcast %cst_7 : f32 to vector<4x10x64xf32>
    %13 = arith.select %11, %0, %12 : vector<4x10x64xi1>, vector<4x10x64xf32>
    %cst_8 = arith.constant dense<0xFF800000> : vector<4x64xf32>
    %14 = vector.multi_reduction <maximumf>, %13, %cst_8 [1] : vector<4x10x64xf32> to vector<4x64xf32>
    %15 = vector.extract_strided_slice %7 {offsets = [0, 0], sizes = [2, 64], strides = [1, 1]} : vector<4x64xf32> to vector<2x64xf32>
    %16 = arith.truncf %15 : vector<2x64xf32> to vector<2x64xbf16>
    %c0_9 = arith.constant 0 : index
    %c0_10 = arith.constant 0 : index
    %17 = vector.load %arg2[%c0_9, %c0_10] : memref<64x32xbf16, #tpu.memory_space<vmem>>, vector<64x32xbf16>
    %cst_11 = arith.constant dense<0.000000e+00> : vector<2x32xf32>
    %18 = tpu.matmul %16, %17, %cst_11 {dimension_numbers = #tpu.dot_dimension_numbers<[1], [0], [0], [1], [0, 0, 1, 1], [], []>} : vector<2x64xbf16>, vector<64x32xbf16>, vector<2x32xf32> -> vector<2x32xf32>
    %19 = vector.extract_strided_slice %14 {offsets = [0, 0], sizes = [2, 64], strides = [1, 1]} : vector<4x64xf32> to vector<2x64xf32>
    %20 = arith.truncf %19 : vector<2x64xf32> to vector<2x64xbf16>
    %c0_12 = arith.constant 0 : index
    %c0_13 = arith.constant 0 : index
    %21 = vector.load %arg3[%c0_12, %c0_13] : memref<64x32xbf16, #tpu.memory_space<vmem>>, vector<64x32xbf16>
    %cst_14 = arith.constant dense<0.000000e+00> : vector<2x32xf32>
    %22 = tpu.matmul %20, %21, %cst_14 {dimension_numbers = #tpu.dot_dimension_numbers<[1], [0], [0], [1], [0, 0, 1, 1], [], []>} : vector<2x64xbf16>, vector<64x32xbf16>, vector<2x32xf32> -> vector<2x32xf32>
    %23 = arith.addf %18, %22 : vector<2x32xf32>
    %24 = vector.extract_strided_slice %7 {offsets = [2, 0], sizes = [2, 64], strides = [1, 1]} : vector<4x64xf32> to vector<2x64xf32>
    %25 = arith.truncf %24 : vector<2x64xf32> to vector<2x64xbf16>
    %c0_15 = arith.constant 0 : index
    %c0_16 = arith.constant 0 : index
    %26 = vector.load %arg4[%c0_15, %c0_16] : memref<64x32xbf16, #tpu.memory_space<vmem>>, vector<64x32xbf16>
    %cst_17 = arith.constant dense<0.000000e+00> : vector<2x32xf32>
    %27 = tpu.matmul %25, %26, %cst_17 {dimension_numbers = #tpu.dot_dimension_numbers<[1], [0], [0], [1], [0, 0, 1, 1], [], []>} : vector<2x64xbf16>, vector<64x32xbf16>, vector<2x32xf32> -> vector<2x32xf32>
    %28 = arith.addf %23, %27 : vector<2x32xf32>
    %29 = vector.extract_strided_slice %14 {offsets = [2, 0], sizes = [2, 64], strides = [1, 1]} : vector<4x64xf32> to vector<2x64xf32>
    %30 = arith.truncf %29 : vector<2x64xf32> to vector<2x64xbf16>
    %c0_18 = arith.constant 0 : index
    %c0_19 = arith.constant 0 : index
    %31 = vector.load %arg5[%c0_18, %c0_19] : memref<64x32xbf16, #tpu.memory_space<vmem>>, vector<64x32xbf16>
    %cst_20 = arith.constant dense<0.000000e+00> : vector<2x32xf32>
    %32 = tpu.matmul %30, %31, %cst_20 {dimension_numbers = #tpu.dot_dimension_numbers<[1], [0], [0], [1], [0, 0, 1, 1], [], []>} : vector<2x64xbf16>, vector<64x32xbf16>, vector<2x32xf32> -> vector<2x32xf32>
    %33 = arith.addf %28, %32 : vector<2x32xf32>
    %c0_21 = arith.constant 0 : index
    %c0_22 = arith.constant 0 : index
    %34 = vector.load %arg6[%c0_21, %c0_22] : memref<1x32xf32, #tpu.memory_space<vmem>>, vector<1x32xf32>
    %35 = vector.broadcast %34 : vector<1x32xf32> to vector<2x32xf32>
    %36 = arith.addf %33, %35 : vector<2x32xf32>
    %37 = math.tanh %36 : vector<2x32xf32>
    %38 = arith.truncf %37 : vector<2x32xf32> to vector<2x32xbf16>
    %c0_23 = arith.constant 0 : index
    %c0_24 = arith.constant 0 : index
    %39 = vector.load %arg7[%c0_23, %c0_24] : memref<32x3xbf16, #tpu.memory_space<vmem>>, vector<32x3xbf16>
    %cst_25 = arith.constant dense<0.000000e+00> : vector<2x3xf32>
    %40 = tpu.matmul %38, %39, %cst_25 {dimension_numbers = #tpu.dot_dimension_numbers<[1], [0], [0], [1], [0, 0, 1, 1], [], []>} : vector<2x32xbf16>, vector<32x3xbf16>, vector<2x3xf32> -> vector<2x3xf32>
    %c0_26 = arith.constant 0 : index
    %c0_27 = arith.constant 0 : index
    %41 = vector.load %arg8[%c0_26, %c0_27] : memref<1x3xf32, #tpu.memory_space<vmem>>, vector<1x3xf32>
    %42 = vector.broadcast %41 : vector<1x3xf32> to vector<2x3xf32>
    %43 = arith.addf %40, %42 : vector<2x3xf32>
    %c0_28 = arith.constant 0 : index
    %c0_29 = arith.constant 0 : index
    %44 = vector.load %arg9[%c0_28, %c0_29] : memref<2x3xf32, #tpu.memory_space<vmem>>, vector<2x3xf32>
    tpu.vector_store %arg9[%c0_28, %c0_29], %43 {strides = array<i32>} : memref<2x3xf32, #tpu.memory_space<vmem>>, vector<2x3xf32>,
    %cst_30 = arith.constant dense<0xFF800000> : vector<2xf32>
    %45 = vector.multi_reduction <maximumf>, %43, %cst_30 [1] : vector<2x3xf32> to vector<2xf32>
    %cst_31 = arith.constant 0xFF800000 : f32
    %46 = vector.broadcast %cst_31 : f32 to vector<2xf32>
    %47 = arith.maximumf %46, %45 : vector<2xf32>
    %48 = vector.shape_cast %47 : vector<2xf32> to vector<2x1xf32>
    %49 = vector.broadcast %48 : vector<2x1xf32> to vector<2x3xf32>
    %50 = arith.subf %43, %49 : vector<2x3xf32>
    %51 = math.exp %50 : vector<2x3xf32>
    %cst_32 = arith.constant dense<0.000000e+00> : vector<2xf32>
    %52 = vector.multi_reduction <add>, %51, %cst_32 [1] : vector<2x3xf32> to vector<2xf32>
    %53 = vector.shape_cast %52 : vector<2xf32> to vector<2x1xf32>
    %54 = vector.broadcast %53 : vector<2x1xf32> to vector<2x3xf32>
    %55 = arith.divf %51, %54 : vector<2x3xf32>
    %c0_33 = arith.constant 0 : index
    %c0_34 = arith.constant 0 : index
    %56 = vector.load %arg10[%c0_33, %c0_34] : memref<2x3xf32, #tpu.memory_space<vmem>>, vector<2x3xf32>
    tpu.vector_store %arg10[%c0_33, %c0_34], %55 {strides = array<i32>} : memref<2x3xf32, #tpu.memory_space<vmem>>, vector<2x3xf32>,
    return
  }
}

</mosaic_0001>

<bundles_post_ra>
// kernel: esim_forward.8
= control target key start
LH: loop header
LB: loop body
LE: loop exit
PB: predicated region body
PF: predicated region fallthrough
CT: control target
= control target key end

     0   :  { %s971_s24 = smov 0   ;;  %s973_s25 = smov 0   ;;  %s1103_s0 = inlined_call_operand.vmem [shape: f32[10,4,128], index: 0, kind: input, shape index: {}]   ;;  %s1104_s1 = inlined_call_operand.vmem [shape: f32[10,4,128], index: 1, kind: input, shape index: {}]   ;;  %s1105_s2 = inlined_call_operand.vmem [shape: f32[10,4,1], index: 2, kind: input, shape index: {}, may-alias: {2,3}]   ;;  %s1106_s3 = inlined_call_operand.vmem [shape: f32[10,4,1], index: 3, kind: input, shape index: {}, may-alias: {2,3}]   ;;  %s1107_s4 = inlined_call_operand.vmem [shape: bf16[32,128], index: 4, kind: input, shape index: {}]   ;;  %s1108_s5 = inlined_call_operand.vmem [shape: bf16[32,128], index: 5, kind: input, shape index: {}]   ;;  %s1109_s6 = inlined_call_operand.vmem [shape: f32[10,4,32], index: 6, kind: output, shape index: {0}]   ;;  %s1110_s7 = inlined_call_operand.vmem [shape: f32[10,4,32], index: 7, kind: output, shape index: {1}]  }
   0x1   :  { %s975_s26 = smov 0  }
   0x2 LB: > { %s27_s27 = sadd.s32 1, %s920_s25  ;;  %p821_p0 = scmp.ge.s32.totalorder %s924_s26, 1  ;;  %s924_s26 = sphi %s975_s26, %s18_s26   ;;  %s920_s25 = sphi %s973_s25, %s1112_s25   ;;  %s916_s24 = sphi %s971_s24, %s1111_s24  }
   0x3   : > { %p28_p1 = scmp.ge.s32.totalorder %s27_s27, 10  ;;  %p312_p2 = scmp.lt.s32.totalorder %s924_s26, 11 }
   0x5   : > { %s1114_s27 = smov (%p28_p1, %s27_s27), 0  ;;  %p313_p3 = pnand %p821_p0, %p312_p2 }
   0x6   : > { %p379_p4 = scmp.lt.s32.totalorder (!%p313_p3), %s916_s24, 9  ;;  %s386_s28 = ssub.s32 (!%p313_p3), 9, %s916_s24 }
   0x7   : > { %316 = sbr.rel (%p313_p3) target bundleno = 639 (0x27f), region = 44  ;;  %p387_p5 = scmp.lt.s32.totalorder (!%p313_p3), %s386_s28, 9 }
   0x8   : > { %p828_p6 = scmp.ne.s32.totalorder (!%p313_p3), %s916_s24, 0 }
   0xc   : > { %s380_s29 = scalar_select %p379_p4, %s916_s24, 9 }
   0xd   : > { %s1116_s28 = smov (!%p387_p5, %s386_s28), 9  ;;  %431 = sbr.rel (%p828_p6) target bundleno = 23 (0x17), region = 48 }
   0xe   : > { %s989_s30 = sshll.u32 %s380_s29, 2  ;;  %s995_s11 = sshll.u32 %s1116_s28, 2 }
   0xf   : > { %s385_s10 = scalar_lea.vmem %s1103_s0, %s989_s30  ;;  %s393_s14 = scalar_lea.vmem %s1104_s1, %s995_s11 }
  0x10   : > { %s401_s17 = scalar_lea.vmem %s1105_s2, %s989_s30  ;;  %s409_s20 = scalar_lea.vmem %s1106_s3, %s995_s11 }
  0x11   : > { %s417_s23 = scalar_lea.vmem %s1109_s6, %s989_s30  ;;  %s425_s8 = scalar_lea.vmem %s1110_s7, %s995_s11 }
  0x12   : > { %vm432_vm0 = vcmask 257024   ;;  %v926_v0 = vmov 0.0  }
  0x13   : > { %433 = vst.msk [vmem:[#allocation2] sm:$0xf] %vm432_vm0, %v926_v0 }
  0x14   : > { %434 = vst.msk [vmem:[#allocation3] sm:$0xf] %vm432_vm0, %v926_v0 }
  0x15   : > { %435 = vst.msk [vmem:[#allocation4] sm:$0xf] %vm432_vm0, %v926_v0 }
  0x16   : > { %436 = vst.msk [vmem:[#allocation5] sm:$0xf] %vm432_vm0, %v926_v0 }
  0x17 PF: > { %v852_v1 = vld [vmem:[%s1107_s4 + $0x8] sm:$0xff]  ;;  %v851_v3 = vld [vmem:[%s1107_s4] sm:$0xff]  ;;  %s927_s21 = smov 32   ;;  %vm458_vm1 = vcmask 261120   ;;  %s928_s12 = smov 64   ;;  %v929_v28 = vmov 0  }
  0x18   : > { %v854_v2 = vld [vmem:[%s1108_s5 + $0x8] sm:$0xff]  ;;  %v853_v4 = vld [vmem:[%s1108_s5] sm:$0xff]  ;;  %468 = vmatpush.bf16.msra.mxu0 %v852_v1  ;;  %884 = vset.pattern.permute.xlu2 %v929_v28  ;;  %s930_s13 = smov 96   ;;  %vm532_vm13 = vcmask 257024  }
  0x19   : > { %576 = vmatpush.bf16.msra.mxu1 %v854_v2  ;;  %v437_v11 = vld [vmem:[%s385_s10] sm:$0xf]  ;;  %885 = vset.pattern.permute.xlu0 %v929_v28 }
  0x1a   : > { %v1029_v5 = vld [vmem:[#allocation2] sm:$0xf] }
  0x1b   : > { %v440_v7 = vld [vmem:[#allocation3] sm:$0xf]  ;;  %v441_v8 = vpack.c.bf16 %v1029_v5, %v1029_v5  ;;  %v546_v15 = vld [vmem:[%s393_s14] sm:$0xf] }
  0x1c   : > { %v1031_v6 = vld [vmem:[#allocation4] sm:$0xf]  ;;  %497 = vrot.lane.b32.xlu1 %v440_v7, %s927_s21  ;;  %469 = vmatpush.bf16.msra.mxu0 %v851_v3  ;;  %v438_v52 = vld [vmem:[%s401_s17] sm:$0xf] }
  0x1d   : > { %v550_v9 = vpack.c.bf16 %v1031_v6, %v1031_v6  ;;  %577 = vmatpush.bf16.msra.mxu1 %v853_v4  ;;  %v549_v10 = vld [vmem:[#allocation5] sm:$0xf]  ;;  %vm517_vm10 = vcmp.gt.f32.partialorder %v438_v52, 0.0  ;;  %v547_v63 = vld [vmem:[%s409_s20] sm:$0xf] }
  0x1e   : > { %v518_v53 = vsel %vm517_vm10, 1, %v929_v28  ;;  %vm625_vm11 = vcmp.gt.f32.partialorder %v547_v63, 0.0 }
  0x1f   : > { %837 = vmatmul.msk.bf16.vlgmr.msra.gmra.mxu0 %vm458_vm1, %v441_v8  ;;  %v626_v0 = vsel %vm625_vm11, 1, %v929_v28 }
  0x20   : > { %847 = vmatmul.msk.bf16.vlgmr.msra.gmra.mxu1 %vm458_vm1, %v550_v9 }
  0x24   : > { %605 = vrot.lane.b32.xlu1 %v549_v10, %s927_s21 }
  0x8e   : > { %v498_v54 = vpop.permute.xlu1 %497 }
  0x96   : > { %v606_v58 = vpop.permute.xlu1 %605 }
  0x9c   : > { %v471_v12 = vpop.f32.mrf.mxu0 }
  0x9d   : > { %v579_v13 = vpop.f32.mrf.mxu1  ;;  %v475_v14 = vadd.f32 %v471_v12, %v437_v11 }
  0x9e   : > { %v583_v16 = vadd.f32 %v579_v13, %v546_v15 }
  0x9f   : > { %886 = vtanh.f32 %v475_v14  ;;  %v838_v21 = vmul.f32 -1.442695, %v475_v14 }
  0xa0   : > { %888 = vtanh.f32 %v583_v16  ;;  %v848_v22 = vmul.f32 -1.442695, %v583_v16 }
  0xa1   : > { %890 = vpow2.f32 %v838_v21 }
  0xa2   : > { %892 = vpow2.f32 %v848_v22 }
  0xa4   : > { %v473_v17 = vpop.f32.mrf.mxu0 }
  0xa5   : > { %v581_v18 = vpop.f32.mrf.mxu1  ;;  %v887_v19 = vpop.eup %886 }
  0xa6   : > { %502 = vrot.lane.b32.xlu0 %v887_v19, %s928_s12  ;;  %v889_v20 = vpop.eup %888 }
  0xa7   : > { %v891_v23 = vpop.eup %890 }
  0xa8   : > { %v479_v24 = vadd.f32 1.0, %v891_v23  ;;  %v893_v25 = vpop.eup %892 }
  0xa9   : > { %v587_v26 = vadd.f32 1.0, %v893_v25 }
  0xaa   : > { %894 = vrcp.f32 %v479_v24  ;;  %v491_v36 = vand.u32 2147483648, %v479_v24  ;;  %vm485_vm3 = vweird.f32 %v479_v24  ;;  %v489_v37 = vand.u32 2147483647, %v479_v24 }
  0xab   : > { %896 = vrcp.f32 %v587_v26  ;;  %vm593_vm6 = vweird.f32 %v587_v26  ;;  %v599_v45 = vand.u32 2147483648, %v587_v26  ;;  %v597_v46 = vand.u32 2147483647, %v587_v26 }
  0xac   : > { %v492_v40 = vor.u32 1.1754944e-38, %v491_v36  ;;  %vm490_vm5 = vcmp.eq.f32.partialorder %v489_v37, 8.507059e+37 }
  0xad   : > { %v600_v48 = vor.u32 1.1754944e-38, %v599_v45  ;;  %vm598_vm9 = vcmp.eq.f32.partialorder %v597_v46, 8.507059e+37 }
  0xae   : > { %610 = vrot.lane.b32.xlu0 %v889_v20, %s928_s12 }
  0xb0   : > { %v895_v27 = vpop.eup %894 }
  0xb1   : > { %v481_v29 = vmul.f32 %v895_v27, %v479_v24  ;;  %v897_v31 = vpop.eup %896  ;;  %vm486_vm2 = vweird.f32 %v895_v27 }
  0xb2   : > { %v589_v33 = vmul.f32 %v897_v31, %v587_v26  ;;  %vm487_vm4 = vmor %vm485_vm3, %vm486_vm2  ;;  %vm594_vm7 = vweird.f32 %v897_v31 }
  0xb3   : > { %v482_v30 = vsub.f32 1.0, %v481_v29  ;;  %vm595_vm8 = vmor %vm593_vm6, %vm594_vm7 }
  0xb4   : > { %v590_v35 = vsub.f32 1.0, %v589_v33 }
  0xb5   : > { %v483_v32 = vmul.f32 %v895_v27, %v482_v30 }
  0xb6   : > { %v591_v39 = vmul.f32 %v897_v31, %v590_v35 }
  0xb7   : > { %v484_v34 = vadd.f32 %v895_v27, %v483_v32 }
  0xb8   : > { %v592_v43 = vadd.f32 %v897_v31, %v591_v39 }
  0xb9   : > { %v488_v38 = vsel %vm487_vm4, %v895_v27, %v484_v34 }
  0xba   : > { %v493_v41 = vsel %vm490_vm5, %v492_v40, %v488_v38  ;;  %v596_v47 = vsel %vm595_vm8, %v897_v31, %v592_v43 }
  0xbb   : > { %v601_v49 = vsel %vm598_vm9, %v600_v48, %v596_v47  ;;  %v500_v55 = vmul.f32 %v498_v54, %v493_v41 }
  0xbc   : > { %v608_v59 = vmul.f32 %v606_v58, %v601_v49 }
 0x118   : > { %v503_v42 = vpop.permute.xlu0 %502 }
 0x119   : > { %v505_v44 = vmul.f32 %v503_v42, %v493_v41 }
 0x11b   : > { %507 = vrot.lane.b32.xlu2 %v505_v44, %s927_s21 }
 0x120   : > { %v611_v50 = vpop.permute.xlu0 %610 }
 0x121   : > { %v613_v51 = vmul.f32 %v611_v50, %v601_v49 }
 0x123   : > { %615 = vrot.lane.b32.xlu2 %v613_v51, %s927_s21 }
 0x12b   : > { %520 = vperm.xlu2 %884, %v518_v53  }
 0x133   : > { %632 = vrot.lane.b32.xlu2 %v1031_v6, %s930_s13 }
 0x175   : > { %v508_v56 = vpop.permute.xlu2 %507 }
 0x176   : > { %v510_v57 = vadd.f32 %v508_v56, %v500_v55 }
 0x178   : > { %898 = vtanh.f32 %v510_v57 }
 0x17d   : > { %v616_v60 = vpop.permute.xlu2 %615 }
 0x17e   : > { %v899_v61 = vpop.eup %898  ;;  %v618_v62 = vadd.f32 %v616_v60, %v608_v59 }
 0x17f   : > { %513 = vrot.lane.b32.xlu0 %v899_v61, %s928_s12 }
 0x180   : > { %900 = vtanh.f32 %v618_v62 }
 0x185   : > { %v521_v1 = vpop.permute.xlu2 %520 }
 0x186   : > { %v901_v2 = vpop.eup %900  ;;  %vm522_vm12 = vcmp.eq.s32.totalorder %v521_v1, 1 }
 0x187   : > { %621 = vrot.lane.b32.xlu1 %v901_v2, %s928_s12  ;;  %628 = vperm.xlu0 %885, %v626_v0   ;;  %v534_v3 = vsel %vm522_vm12, %v510_v57, %v498_v54 }
 0x188   : > { %536 = vrot.lane.b32.xlu2 %v534_v3, %s930_s13 }
 0x18d   : > { %v633_v4 = vpop.permute.xlu2 %632 }
 0x18f   : > { %524 = vrot.lane.b32.xlu1 %v1029_v5, %s930_s13 }
 0x1e2   : > { %v537_v6 = vpop.permute.xlu2 %536 }
 0x1e3   : > { %539 = vst.msk [vmem:[#allocation3] sm:$0xf] %vm532_vm13, %v537_v6 }
 0x1f1   : > { %v514_v7 = vpop.permute.xlu0 %513 }
 0x1f2   : > { %v516_v8 = vmul.f32 %v514_v7, %v493_v41 }
 0x1f4   : > { %v540_v9 = vsel %vm522_vm12, %v516_v8, 0.0 }
 0x1f5   : > { %542 = vrot.lane.b32.xlu0 %v540_v9, %s927_s21 }
 0x1f9   : > { %v622_v10 = vpop.permute.xlu1 %621  ;;  %v629_v11 = vpop.permute.xlu0 %628 }
 0x1fa   : > { %v624_v12 = vmul.f32 %v622_v10, %v601_v49  ;;  %vm630_vm14 = vcmp.eq.s32.totalorder %v629_v11, 1 }
 0x1fb   : > { %v641_v13 = vsel %vm630_vm14, %v618_v62, %v606_v58 }
 0x1fc   : > { %643 = vrot.lane.b32.xlu2 %v641_v13, %s930_s13  ;;  %v647_v5 = vsel %vm630_vm14, %v624_v12, 0.0  ;;  %v635_v16 = vsel %vm630_vm14, %v624_v12, %v633_v4 }
 0x1fd   : > { %649 = vrot.lane.b32.xlu0 %v647_v5, %s927_s21 }
 0x201   : > { %v525_v14 = vpop.permute.xlu1 %524 }
 0x202   : > { %v527_v15 = vsel %vm522_vm12, %v516_v8, %v525_v14 }
 0x203   : > { %529 = vrot.lane.b32.xlu1 %v527_v15, %s927_s21 }
 0x20b   : > { %637 = vrot.lane.b32.xlu1 %v635_v16, %s927_s21 }
 0x256   : > { %v644_v17 = vpop.permute.xlu2 %643 }
 0x257   : > { %646 = vst.msk [vmem:[#allocation5] sm:$0xf] %vm532_vm13, %v644_v17 }
 0x267   : > { %v543_v18 = vpop.permute.xlu0 %542 }
 0x268   : > { %545 = vst.msk [vmem:[%s417_s23] sm:$0xf] %vm532_vm13, %v543_v18 }
 0x26f   : > { %v650_v19 = vpop.permute.xlu0 %649 }
 0x270   : > { %652 = vst.msk [vmem:[%s425_s8] sm:$0xf] %vm532_vm13, %v650_v19 }
 0x275   : > { %v530_v20 = vpop.permute.xlu1 %529 }
 0x276   : > { %533 = vst.msk [vmem:[#allocation2] sm:$0xf] %vm532_vm13, %v530_v20 }
 0x27d   : > { %v638_v21 = vpop.permute.xlu1 %637 }
 0x27e   : > { %640 = vst.msk [vmem:[#allocation4] sm:$0xf] %vm532_vm13, %v638_v21 }
 0x27f PF: > { %s18_s26 = sadd.s32 1, %s924_s26   ;;  %s1111_s24 = smov %s920_s25 }
 0x280   : > { %p15_p7 = scmp.ge.s32.totalorder %s18_s26, 12   ;;  %s1112_s25 = smov %s1114_s27 }
 0x282   :  { %17 = sbr.rel (!%p15_p7) target bundleno = 2 (0x2), region = 99 }

// kernel: esim_forward.7
= control target key start
LH: loop header
LB: loop body
LE: loop exit
PB: predicated region body
PF: predicated region fallthrough
CT: control target
= control target key end

     0   :  { %vm51_vm0 = vcmask 261120   ;;  %s275_s1 = inlined_call_operand.vmem [shape: bf16[32,128], index: 1, kind: input, shape index: {}]   ;;  %s276_s3 = inlined_call_operand.vmem [shape: bf16[32,128], index: 3, kind: input, shape index: {}]   ;;  %s277_s0 = inlined_call_operand.vmem [shape: f32[40,32], index: 0, kind: input, shape index: {}]   ;;  %s278_s2 = inlined_call_operand.vmem [shape: f32[1,128], index: 2, kind: input, shape index: {}]   ;;  %s279_s4 = inlined_call_operand.vmem [shape: f32[1,128], index: 4, kind: input, shape index: {}]   ;;  %s280_s5 = inlined_call_operand.vmem [shape: f32[40,128], index: 5, kind: output, shape index: {0}]   ;;  %s281_s6 = inlined_call_operand.vmem [shape: f32[40,128], index: 6, kind: output, shape index: {1}]  }
   0x1   :  { %v168_v0 = vld [vmem:[%s275_s1 + $0x8] sm:$0xff]  ;;  %v167_v2 = vld [vmem:[%s275_s1] sm:$0xff]  ;;  %v25_v4 = vld [vmem:[%s277_s0 + $0x10] sm:$0xff] }
   0x2   :  { %v170_v1 = vld [vmem:[%s276_s3 + $0x8] sm:$0xff]  ;;  %171 = vmatpush.bf16.msra.mxu2 %v168_v0  ;;  %v169_v3 = vld [vmem:[%s276_s3] sm:$0xff]  ;;  %v26_v5 = vld [vmem:[%s277_s0 + $0x18] sm:$0xff]  ;;  %67 = vmatpush.bf16.msra.mxu0 %v168_v0 }
   0x3   :  { %173 = vmatpush.bf16.msra.mxu3 %v170_v1  ;;  %115 = vmatpush.bf16.msra.mxu1 %v170_v1  ;;  %v23_v6 = vld [vmem:[%s277_s0] sm:$0xff]  ;;  %v24_v7 = vld [vmem:[%s277_s0 + $0x8] sm:$0xff]  ;;  %v29_v8 = vpack.c.bf16 %v26_v5, %v25_v4 }
   0x4   :  { %v28_v9 = vpack.c.bf16 %v24_v7, %v23_v6  ;;  %v27_v10 = vld [vmem:[%s277_s0 + $0x20] sm:$0xff] }
   0x5   :  { %v30_v11 = vpack.c.bf16 %v27_v10, %v27_v10  ;;  %v175_v12 = vld [vmem:[%s278_s2] ss:$0 sm:$0xff] }
   0x6   :  { %172 = vmatpush.bf16.msra.mxu2 %v167_v2  ;;  %68 = vmatpush.bf16.msra.mxu0 %v167_v2  ;;  %v176_v13 = vld [vmem:[%s279_s4] ss:$0 sm:$0xff] }
   0x7   :  { %174 = vmatpush.bf16.msra.mxu3 %v169_v3  ;;  %116 = vmatpush.bf16.msra.mxu1 %v169_v3 }
   0x9   :  { %154 = vmatmul.msk.bf16.vlgmr.msra.gmra.mxu2 %vm51_vm0, %v29_v8  ;;  %153 = vmatmul.msk.bf16.vlgmr.msra.gmra.mxu0 %vm51_vm0, %v28_v9 }
   0xa   :  { %165 = vmatmul.msk.bf16.vlgmr.msra.gmra.mxu3 %vm51_vm0, %v29_v8  ;;  %164 = vmatmul.msk.bf16.vlgmr.msra.gmra.mxu1 %vm51_vm0, %v28_v9 }
  0x19   :  { %155 = vmatmul.msk.bf16.gmra.mxu2 %vm51_vm0, %v30_v11 }
  0x1a   :  { %166 = vmatmul.msk.bf16.gmra.mxu3 %vm51_vm0, %v30_v11 }
  0x86   :  { %v70_v14 = vpop.f32.mrf.mxu0 }
  0x87   :  { %v118_v15 = vpop.f32.mrf.mxu1  ;;  %v71_v16 = vadd.f32 %v175_v12, %v70_v14 }
  0x88   :  { %v119_v17 = vadd.f32 %v176_v13, %v118_v15 }
  0x89   :  { %84 = vst [vmem:[%s280_s5] sm:$0xff] %v71_v16 }
  0x8a   :  { %132 = vst [vmem:[%s281_s6] sm:$0xff] %v119_v17 }
  0x8c   :  { %v75_v18 = vpop.f32.mrf.mxu2 }
  0x8d   :  { %v123_v19 = vpop.f32.mrf.mxu3  ;;  %v76_v20 = vadd.f32 %v175_v12, %v75_v18 }
  0x8e   :  { %v124_v21 = vadd.f32 %v176_v13, %v123_v19  ;;  %v72_v22 = vpop.f32.mrf.mxu0 }
  0x8f   :  { %86 = vst [vmem:[%s280_s5 + $0x10] sm:$0xff] %v76_v20  ;;  %v120_v23 = vpop.f32.mrf.mxu1  ;;  %v73_v24 = vadd.f32 %v175_v12, %v72_v22 }
  0x90   :  { %134 = vst [vmem:[%s281_s6 + $0x10] sm:$0xff] %v124_v21  ;;  %v121_v25 = vadd.f32 %v176_v13, %v120_v23 }
  0x91   :  { %85 = vst [vmem:[%s280_s5 + $0x8] sm:$0xff] %v73_v24 }
  0x92   :  { %133 = vst [vmem:[%s281_s6 + $0x8] sm:$0xff] %v121_v25 }
  0x94   :  { %v77_v26 = vpop.f32.mrf.mxu2 }
  0x95   :  { %v125_v27 = vpop.f32.mrf.mxu3  ;;  %v78_v28 = vadd.f32 %v175_v12, %v77_v26 }
  0x96   :  { %v126_v29 = vadd.f32 %v176_v13, %v125_v27 }
  0x97   :  { %87 = vst [vmem:[%s280_s5 + $0x18] sm:$0xff] %v78_v28 }
  0x98   :  { %135 = vst [vmem:[%s281_s6 + $0x18] sm:$0xff] %v126_v29 }
  0x9c   :  { %v80_v30 = vpop.f32.mrf.mxu2 }
  0x9d   :  { %v128_v31 = vpop.f32.mrf.mxu3  ;;  %v81_v32 = vadd.f32 %v175_v12, %v80_v30 }
  0x9e   :  { %v129_v33 = vadd.f32 %v176_v13, %v128_v31 }
  0x9f   :  { %88 = vst [vmem:[%s280_s5 + $0x20] sm:$0xff] %v81_v32 }
  0xa0   :  { %136 = vst [vmem:[%s281_s6 + $0x20] sm:$0xff] %v129_v33 }
  0xa4   :  { %v82_v34 = vpop.f32.mrf.mxu2 }
  0xa5   :  { %v130_v35 = vpop.f32.mrf.mxu3 }

// kernel: esim_forward.9
= control target key start
LH: loop header
LB: loop body
LE: loop exit
PB: predicated region body
PF: predicated region fallthrough
CT: control target
= control target key end

     0   :  { %vm1467_vm0 = vcmask 523264   ;;  %vm1468_vm1 = vcmask 80896   ;;  %vm216_vm2 = vcmask 74752   ;;  %s1459_s1 = inlined_call_operand.vmem [shape: f32[4,10,64], index: 1, kind: input, shape index: {}, may-alias: {0,1}]   ;;  %s1460_s0 = inlined_call_operand.vmem [shape: f32[4,10,64], index: 0, kind: input, shape index: {}, may-alias: {0,1}]   ;;  %s1461_s5 = inlined_call_operand.vmem [shape: f32[4,1,10], index: 5, kind: input, shape index: {}, may-alias: {4,5}]   ;;  %s1462_s4 = inlined_call_operand.vmem [shape: f32[4,1,10], index: 4, kind: input, shape index: {}, may-alias: {4,5}]   ;;  %s1463_s2 = inlined_call_operand.vmem [shape: f32[4,10,1], index: 2, kind: input, shape index: {}, may-alias: {2,3}]   ;;  %s1464_s3 = inlined_call_operand.vmem [shape: f32[4,10,1], index: 3, kind: input, shape index: {}, may-alias: {2,3}]   ;;  %s1465_s6 = inlined_call_operand.vmem [shape: f32[2,10,64], index: 6, kind: output, shape index: {0}]   ;;  %s1466_s7 = inlined_call_operand.vmem [shape: f32[2,10,64], index: 7, kind: output, shape index: {1}]  }
   0x1   :  { %v771_v0 = vld [vmem:[%s1459_s1 + $0x20] sm:$0xff]  ;;  %v772_v1 = vld [vmem:[%s1459_s1 + $0x28] sm:$0x3]  ;;  %v97_v7 = vld [vmem:[%s1460_s0 + $0x10] sm:$0xff] }
   0x2   :  { %v95_v2 = vld [vmem:[%s1460_s0] sm:$0xff]  ;;  %v107_v3 = vpack.c.bf16 %v771_v0, %v771_v0  ;;  %v108_v4 = vpack.c.bf16 %v772_v1, %v772_v1  ;;  %v96_v5 = vld [vmem:[%s1460_s0 + $0x8] sm:$0x3]  ;;  %v98_v8 = vld [vmem:[%s1460_s0 + $0x18] sm:$0x3]  ;;  %v101_v10 = vpack.c.bf16 %v97_v7, %v97_v7 }
   0x3   :  { %v99_v6 = vpack.c.bf16 %v95_v2, %v95_v2  ;;  %v100_v9 = vpack.c.bf16 %v96_v5, %v96_v5  ;;  %v102_v11 = vpack.c.bf16 %v98_v8, %v98_v8  ;;  %v773_v12 = vld [vmem:[%s1459_s1 + $0x30] sm:$0xff]  ;;  %v774_v13 = vld [vmem:[%s1459_s1 + $0x38] sm:$0x3]  ;;  %v937_v32 = vld [vmem:[%s1461_s5 + $0x2] ss:$0 sm:$0xff] }
   0x4   :  { %v118_v14 = vunpack.c.l.b16 %v107_v3  ;;  %v119_v15 = vunpack.c.l.b16 %v108_v4  ;;  %v109_v17 = vpack.c.bf16 %v773_v12, %v773_v12  ;;  %v144_v19 = vunpack.c.l.b16 %v101_v10  ;;  %v944_v36 = vld [vmem:[%s1462_s4] ss:$0 sm:$0xff]  ;;  %v949_v37 = vld [vmem:[%s1462_s4 + $0x1] ss:$0 sm:$0xff]  ;;  %v962_v52 = vld [vmem:[%s1461_s5 + $0x3] ss:$0 sm:$0xff] }
   0x5   :  { %v113_v16 = vunpack.c.l.b16 %v99_v6  ;;  %v114_v18 = vunpack.c.l.b16 %v100_v9  ;;  %v145_v20 = vunpack.c.l.b16 %v102_v11  ;;  %v110_v21 = vpack.c.bf16 %v774_v13, %v774_v13 }
   0x6   :  { %v910_v22 = vpack.c.b16 %v119_v15, %v118_v14  ;;  %v149_v23 = vunpack.c.l.b16 %v109_v17 }
   0x7   :  { %v912_v24 = vpack.c.b16 %v114_v18, %v113_v16  ;;  %v914_v25 = vpack.c.b16 %v145_v20, %v144_v19  ;;  %v150_v26 = vunpack.c.l.b16 %v110_v21 }
   0x8   :  { %v126_v27 = vsel %vm1467_vm0, %v910_v22, 0 }
   0x9   :  { %135 = vmatpush.bf16.xpose.msra.mxu0 %v126_v27  ;;  %v123_v28 = vsel %vm1467_vm0, %v912_v24, 0  ;;  %v153_v29 = vsel %vm1467_vm0, %v914_v25, 0  ;;  %v922_v30 = vpack.c.b16 %v150_v26, %v149_v23 }
   0xa   :  { %179 = vmatpush.bf16.xpose.msra.mxu2 %v123_v28  ;;  %193 = vmatpush.bf16.xpose.msra.mxu3 %v153_v29 }
   0xb   :  { %v156_v31 = vsel %vm1467_vm0, %v922_v30, 0 }
   0xc   :  { %165 = vmatpush.bf16.xpose.msra.mxu1 %v156_v31 }
  0x10   :  { %775 = vmatmul.msk.bf16.vlgmr.msra.gmra.mxu0 %vm1467_vm0, %v912_v24 }
  0x11   :  { %777 = vmatmul.msk.bf16.vlgmr.msra.gmra.mxu2 %vm1467_vm0, %v910_v22  ;;  %778 = vmatmul.msk.bf16.vlgmr.msra.gmra.mxu3 %vm1467_vm0, %v922_v30 }
  0x13   :  { %776 = vmatmul.msk.bf16.vlgmr.msra.gmra.mxu1 %vm1467_vm0, %v914_v25 }
  0x8d   :  { %v137_v33 = vpop.f32.mrf.mxu0 }
  0x8e   :  { %v208_v34 = vmul.f32 %v937_v32, %v137_v33 }
  0x90   :  { %v213_v35 = vsel %vm1468_vm1, %v208_v34, -inf  ;;  %v167_v43 = vpop.f32.mrf.mxu1 }
  0x91   :  { %214 = vmax.xlane.f32.xlu2 %v213_v35  ;;  %v210_v56 = vmul.f32 %v962_v52, %v167_v43 }
  0x93   :  { %v220_v59 = vsel %vm1468_vm1, %v210_v56, -inf }
  0x94   :  { %v181_v38 = vpop.f32.mrf.mxu2  ;;  %v195_v39 = vpop.f32.mrf.mxu3 }
  0x95   :  { %v398_v40 = vmul.f32 %v944_v36, %v181_v38  ;;  %v400_v41 = vmul.f32 %v949_v37, %v195_v39  ;;  %v139_v42 = vpop.f32.mrf.mxu0 }
  0x96   :  { %v209_v44 = vmul.f32 %v937_v32, %v139_v42 }
  0x97   :  { %v408_v45 = vsel %vm1468_vm1, %v400_v41, -inf  ;;  %v402_v46 = vsel %vm1468_vm1, %v398_v40, -inf }
  0x98   :  { %409 = vmax.xlane.f32.xlu1 %v408_v45  ;;  %403 = vmax.xlane.f32.xlu0 %v402_v46  ;;  %v217_v47 = vsel %vm216_vm2, %v209_v44, -inf  ;;  %v169_v55 = vpop.f32.mrf.mxu1 }
  0x99   :  { %218 = vmax.xlane.f32.xlu2 %v217_v47  ;;  %v211_v57 = vmul.f32 %v962_v52, %v169_v55 }
  0x9b   :  { %v223_v58 = vsel %vm216_vm2, %v211_v57, -inf }
  0x9c   :  { %v183_v48 = vpop.f32.mrf.mxu2  ;;  %v197_v49 = vpop.f32.mrf.mxu3 }
  0x9d   :  { %v399_v50 = vmul.f32 %v944_v36, %v183_v48  ;;  %v401_v51 = vmul.f32 %v949_v37, %v197_v49 }
  0x9f   :  { %v411_v53 = vsel %vm216_vm2, %v401_v51, -inf  ;;  %v405_v54 = vsel %vm216_vm2, %v399_v50, -inf }
  0xa0   :  { %412 = vmax.xlane.f32.xlu1 %v411_v53  ;;  %406 = vmax.xlane.f32.xlu0 %v405_v54 }
  0xa8   :  { %224 = vmax.xlane.f32.xlu1 %v223_v58  ;;  %221 = vmax.xlane.f32.xlu0 %v220_v59 }
 0x104   :  { %v215_v60 = vpop.xlane.xlu2 %214 }
 0x105   :  { %v226_v61 = vsub.f32 %v208_v34, %v215_v60 }
 0x107   :  { %v230_v62 = vmul.f32 1.442695, %v226_v61 }
 0x109   :  { %797 = vpow2.f32 %v230_v62 }
 0x10b   :  { %v410_v63 = vpop.xlane.xlu1 %409  ;;  %v404_v0 = vpop.xlane.xlu0 %403 }
 0x10c   :  { %v416_v1 = vsub.f32 %v400_v41, %v410_v63  ;;  %v414_v2 = vsub.f32 %v398_v40, %v404_v0  ;;  %v219_v3 = vpop.xlane.xlu2 %218 }
 0x10d   :  { %v227_v6 = vsub.f32 %v209_v44, %v219_v3 }
 0x10e   :  { %v422_v4 = vmul.f32 1.442695, %v416_v1  ;;  %v418_v5 = vmul.f32 1.442695, %v414_v2 }
 0x10f   :  { %v970_v7 = vpop.eup %797  ;;  %v232_v9 = vmul.f32 1.442695, %v227_v6 }
 0x110   :  { %799 = vpow2.f32 %v422_v4  ;;  %v238_v8 = vsel %vm1468_vm1, %v970_v7, 0.0 }
 0x111   :  { %801 = vpow2.f32 %v418_v5  ;;  %239 = vadd.xlane.f32.xlu0 %v238_v8 }
 0x112   :  { %803 = vpow2.f32 %v232_v9 }
 0x113   :  { %v413_v10 = vpop.xlane.xlu1 %412  ;;  %v407_v11 = vpop.xlane.xlu0 %406 }
 0x114   :  { %v417_v12 = vsub.f32 %v401_v51, %v413_v10  ;;  %v415_v13 = vsub.f32 %v399_v50, %v407_v11 }
 0x116   :  { %v974_v14 = vpop.eup %799  ;;  %v424_v15 = vmul.f32 1.442695, %v417_v12  ;;  %v420_v16 = vmul.f32 1.442695, %v415_v13 }
 0x117   :  { %v976_v17 = vpop.eup %801  ;;  %v432_v18 = vsel %vm1468_vm1, %v974_v14, 0.0 }
 0x118   :  { %805 = vpow2.f32 %v424_v15  ;;  %433 = vadd.xlane.f32.xlu1 %v432_v18  ;;  %v426_v19 = vsel %vm1468_vm1, %v976_v17, 0.0  ;;  %v982_v23 = vpop.eup %803 }
 0x119   :  { %807 = vpow2.f32 %v420_v16  ;;  %427 = vadd.xlane.f32.xlu2 %v426_v19  ;;  %v241_v34 = vsel %vm216_vm2, %v982_v23, 0.0 }
 0x11b   :  { %v225_v20 = vpop.xlane.xlu1 %224  ;;  %v222_v21 = vpop.xlane.xlu0 %221 }
 0x11c   :  { %v229_v26 = vsub.f32 %v211_v57, %v225_v20  ;;  %v228_v27 = vsub.f32 %v210_v56, %v222_v21 }
 0x11e   :  { %v984_v28 = vpop.eup %805  ;;  %v236_v29 = vmul.f32 1.442695, %v229_v26  ;;  %v234_v31 = vmul.f32 1.442695, %v228_v27 }
 0x11f   :  { %v986_v33 = vpop.eup %807  ;;  %v435_v35 = vsel %vm216_vm2, %v984_v28, 0.0 }
 0x120   :  { %809 = vpow2.f32 %v236_v29  ;;  %242 = vadd.xlane.f32.xlu1 %v241_v34  ;;  %v429_v38 = vsel %vm216_vm2, %v986_v33, 0.0 }
 0x121   :  { %811 = vpow2.f32 %v234_v31  ;;  %436 = vadd.xlane.f32.xlu2 %v435_v35  ;;  %430 = vadd.xlane.f32.xlu0 %v429_v38 }
 0x126   :  { %v994_v39 = vpop.eup %809 }
 0x127   :  { %v996_v40 = vpop.eup %811  ;;  %v247_v41 = vsel %vm216_vm2, %v994_v39, 0.0 }
 0x128   :  { %v244_v42 = vsel %vm1468_vm1, %v996_v40, 0.0 }
 0x129   :  { %248 = vadd.xlane.f32.xlu0 %v247_v41  ;;  %245 = vadd.xlane.f32.xlu2 %v244_v42 }
 0x184   :  { %v240_v43 = vpop.xlane.xlu0 %239 }
 0x185   :  { %813 = vrcp.f32 %v240_v43  ;;  %v261_v49 = vand.u32 2147483648, %v240_v43  ;;  %v259_v50 = vand.u32 2147483647, %v240_v43  ;;  %vm255_vm3 = vweird.f32 %v240_v43 }
 0x187   :  { %v262_v55 = vor.u32 1.1754944e-38, %v261_v49  ;;  %vm1004_vm4 = vcmp.eq.f32.partialorder %v259_v50, 8.507059e+37 }
 0x18b   :  { %v814_v44 = vpop.eup %813  ;;  %v434_v45 = vpop.xlane.xlu1 %433 }
 0x18c   :  { %v251_v46 = vmul.f32 %v814_v44, %v240_v43  ;;  %815 = vrcp.f32 %v434_v45  ;;  %v428_v47 = vpop.xlane.xlu2 %427  ;;  %v479_v53 = vand.u32 2147483648, %v434_v45  ;;  %vm256_vm5 = vweird.f32 %v814_v44 }
 0x18d   :  { %817 = vrcp.f32 %v428_v47  ;;  %v449_v56 = vand.u32 2147483648, %v428_v47  ;;  %vm473_vm6 = vweird.f32 %v434_v45  ;;  %vm443_vm7 = vweird.f32 %v428_v47  ;;  %vm257_vm8 = vmor %vm255_vm3, %vm256_vm5 }
 0x18e   :  { %v252_v48 = vsub.f32 1.0, %v251_v46  ;;  %v447_v1 = vand.u32 2147483647, %v428_v47  ;;  %v480_v3 = vor.u32 1.1754944e-38, %v479_v53  ;;  %v477_v4 = vand.u32 2147483647, %v434_v45 }
 0x18f   :  { %v450_v6 = vor.u32 1.1754944e-38, %v449_v56 }
 0x190   :  { %v253_v51 = vmul.f32 %v814_v44, %v252_v48  ;;  %vm1031_vm10 = vcmp.eq.f32.partialorder %v447_v1, 8.507059e+37  ;;  %vm1038_vm12 = vcmp.eq.f32.partialorder %v477_v4, 8.507059e+37 }
 0x192   :  { %v1002_v54 = vpop.eup %815  ;;  %v254_v61 = vadd.f32 %v814_v44, %v253_v51 }
 0x193   :  { %v1008_v58 = vpop.eup %817  ;;  %v469_v59 = vmul.f32 %v1002_v54, %v434_v45  ;;  %v1011_v60 = vpop.xlane.xlu1 %242  ;;  %vm474_vm9 = vweird.f32 %v1002_v54 }
 0x194   :  { %v439_v62 = vmul.f32 %v1008_v58, %v428_v47  ;;  %819 = vrcp.f32 %v1011_v60  ;;  %v1015_v63 = vpop.xlane.xlu2 %436  ;;  %v1017_v0 = vpop.xlane.xlu0 %430  ;;  %v276_v9 = vand.u32 2147483648, %v1011_v60  ;;  %v258_v11 = vsel %vm257_vm8, %v814_v44, %v254_v61  ;;  %vm1047_vm13 = vmor %vm473_vm6, %vm474_vm9 }
 0x195   :  { %v470_v2 = vsub.f32 1.0, %v469_v59  ;;  %821 = vrcp.f32 %v1015_v63  ;;  %v494_v10 = vand.u32 2147483648, %v1015_v63  ;;  %v464_v13 = vand.u32 2147483648, %v1017_v0 }
 0x196   :  { %v440_v5 = vsub.f32 1.0, %v439_v62  ;;  %823 = vrcp.f32 %v1017_v0  ;;  %v263_v15 = vsel %vm1004_vm4, %v262_v55, %v258_v11  ;;  %vm444_vm11 = vweird.f32 %v1008_v58 }
 0x197   :  { %v471_v8 = vmul.f32 %v1002_v54, %v470_v2  ;;  %v264_v18 = vmul.f32 %v970_v7, %v263_v15  ;;  %vm270_vm14 = vweird.f32 %v1011_v60  ;;  %vm488_vm15 = vweird.f32 %v1015_v63  ;;  %vm1063_vm3 = vmor %vm443_vm7, %vm444_vm11 }
 0x198   :  { %v441_v12 = vmul.f32 %v1008_v58, %v440_v5  ;;  %v492_v27 = vand.u32 2147483647, %v1015_v63  ;;  %v277_v34 = vor.u32 1.1754944e-38, %v276_v9  ;;  %v495_v35 = vor.u32 1.1754944e-38, %v494_v10 }
 0x199   :  { %v472_v19 = vadd.f32 %v1002_v54, %v471_v8  ;;  %vm458_vm4 = vweird.f32 %v1017_v0  ;;  %v465_v44 = vor.u32 1.1754944e-38, %v464_v13  ;;  %v1074_v48 = vmul.f32 %v937_v32, %v264_v18 }
 0x19a   :  { %v1042_v21 = vpop.eup %819  ;;  %v442_v7 = vadd.f32 %v1008_v58, %v441_v12  ;;  %v274_v49 = vand.u32 2147483647, %v1011_v60  ;;  %vm1085_vm5 = vcmp.eq.f32.partialorder %v492_v27, 8.507059e+37  ;;  %v462_v59 = vand.u32 2147483647, %v1017_v0 }
 0x19b   :  { %v822_v29 = vpop.eup %821  ;;  %v266_v31 = vmul.f32 %v1042_v21, %v1011_v60  ;;  %v476_v38 = vsel %vm1047_vm13, %v1002_v54, %v472_v19  ;;  %vm271_vm6 = vweird.f32 %v1042_v21 }
 0x19c   :  { %v824_v41 = vpop.eup %823  ;;  %v484_v43 = vmul.f32 %v822_v29, %v1015_v63  ;;  %v1069_v45 = vpop.xlane.xlu2 %245  ;;  %v446_v51 = vsel %vm1063_vm3, %v1008_v58, %v442_v7  ;;  %v481_v54 = vsel %vm1038_vm12, %v480_v3, %v476_v38  ;;  %vm489_vm7 = vweird.f32 %v822_v29  ;;  %vm1100_vm9 = vmor %vm270_vm14, %vm271_vm6 }
 0x19d   :  { %v1071_v46 = vpop.xlane.xlu0 %248  ;;  %v267_v50 = vsub.f32 1.0, %v266_v31  ;;  %v454_v47 = vmul.f32 %v824_v41, %v1017_v0  ;;  %825 = vrcp.f32 %v1069_v45  ;;  %v314_v58 = vsel %vm1468_vm1, %v1074_v48, 0.0 }
 0x19e   :  { %v485_v53 = vsub.f32 1.0, %v484_v43  ;;  %827 = vrcp.f32 %v1071_v46  ;;  %v451_v62 = vsel %vm1031_vm10, %v450_v6, %v446_v51  ;;  %vm459_vm8 = vweird.f32 %v824_v41  ;;  %315 = vadd.xlane.f32.xlu2 %v314_v58  ;;  %vm1109_vm10 = vmor %vm488_vm15, %vm489_vm7 }
 0x19f   :  { %v268_v56 = vmul.f32 %v1042_v21, %v267_v50  ;;  %v455_v57 = vsub.f32 1.0, %v454_v47  ;;  %v452_v2 = vmul.f32 %v976_v17, %v451_v62  ;;  %v482_v3 = vmul.f32 %v974_v14, %v481_v54  ;;  %vm460_vm13 = vmor %vm458_vm4, %vm459_vm8 }
 0x1a0   :  { %v486_v61 = vmul.f32 %v822_v29, %v485_v53  ;;  %v291_v5 = vand.u32 2147483648, %v1069_v45  ;;  %v306_v8 = vand.u32 2147483648, %v1071_v46  ;;  %vm1119_vm11 = vcmp.eq.f32.partialorder %v274_v49, 8.507059e+37 }
 0x1a1   :  { %v456_v1 = vmul.f32 %v824_v41, %v455_v57  ;;  %v269_v6 = vadd.f32 %v1042_v21, %v268_v56  ;;  %v1114_v14 = vmul.f32 %v944_v36, %v452_v2  ;;  %v1117_v60 = vmul.f32 %v949_v37, %v482_v3 }
 0x1a2   :  { %v487_v9 = vadd.f32 %v822_v29, %v486_v61  ;;  %vm463_vm12 = vcmp.eq.f32.partialorder %v462_v59, 8.507059e+37  ;;  %v289_v26 = vand.u32 2147483647, %v1069_v45  ;;  %vm285_vm3 = vweird.f32 %v1069_v45 }
 0x1a3   :  { %v826_v10 = vpop.eup %825  ;;  %v457_v12 = vadd.f32 %v824_v41, %v456_v1  ;;  %v273_v16 = vsel %vm1100_vm9, %v1042_v21, %v269_v6  ;;  %v502_v19 = vsel %vm1468_vm1, %v1114_v14, 0.0  ;;  %v508_v20 = vsel %vm1468_vm1, %v1117_v60, 0.0 }
 0x1a4   :  { %v828_v13 = vpop.eup %827  ;;  %v281_v15 = vmul.f32 %v826_v10, %v1069_v45  ;;  %v491_v63 = vsel %vm1109_vm10, %v822_v29, %v487_v9  ;;  %503 = vadd.xlane.f32.xlu1 %v502_v19  ;;  %509 = vadd.xlane.f32.xlu0 %v508_v20  ;;  %v278_v0 = vsel %vm1119_vm11, %v277_v34, %v273_v16  ;;  %vm286_vm14 = vweird.f32 %v826_v10  ;;  %v632_v9 = vld [vmem:[%s1463_s2 + $0x8] sm:$0x3]  ;;  %v785_v19 = vld [vmem:[%s1464_s3 + $0x20] sm:$0xff] }
 0x1a5   :  { %v296_v18 = vmul.f32 %v828_v13, %v1071_v46  ;;  %v496_v21 = vsel %vm1085_vm5, %v495_v35, %v491_v63  ;;  %v461_v27 = vsel %vm460_vm13, %v824_v41, %v457_v12  ;;  %v279_v38 = vmul.f32 %v982_v23, %v278_v0  ;;  %vm287_vm5 = vmor %vm285_vm3, %vm286_vm14 }
 0x1a6   :  { %v282_v7 = vsub.f32 1.0, %v281_v15  ;;  %v497_v31 = vmul.f32 %v984_v28, %v496_v21  ;;  %v466_v42 = vsel %vm463_vm12, %v465_v44, %v461_v27  ;;  %vm301_vm15 = vweird.f32 %v828_v13 }
 0x1a7   :  { %v297_v29 = vsub.f32 1.0, %v296_v18  ;;  %v467_v49 = vmul.f32 %v986_v33, %v466_v42  ;;  %v1149_v35 = vmul.f32 %v937_v32, %v279_v38  ;;  %v304_v34 = vand.u32 2147483647, %v1071_v46  ;;  %v631_v42 = vld [vmem:[%s1463_s2] sm:$0xff] }
 0x1a8   :  { %v283_v43 = vmul.f32 %v826_v10, %v282_v7  ;;  %v1146_v47 = vmul.f32 %v949_v37, %v497_v31  ;;  %vm300_vm4 = vweird.f32 %v1071_v46  ;;  %v292_v41 = vor.u32 1.1754944e-38, %v291_v5 }
 0x1a9   :  { %v298_v50 = vmul.f32 %v828_v13, %v297_v29  ;;  %v1155_v23 = vmul.f32 %v944_v36, %v467_v49  ;;  %v317_v37 = vsel %vm216_vm2, %v1149_v35, 0.0  ;;  %vm302_vm6 = vmor %vm300_vm4, %vm301_vm15  ;;  %v307_v44 = vor.u32 1.1754944e-38, %v306_v8 }
 0x1aa   :  { %v284_v28 = vadd.f32 %v826_v10, %v283_v43  ;;  %v511_v33 = vsel %vm216_vm2, %v1146_v47, 0.0  ;;  %vm290_vm7 = vcmp.eq.f32.partialorder %v289_v26, 8.507059e+37  ;;  %vm305_vm8 = vcmp.eq.f32.partialorder %v304_v34, 8.507059e+37 }
 0x1ab   :  { %v299_v32 = vadd.f32 %v828_v13, %v298_v50  ;;  %v505_v45 = vsel %vm216_vm2, %v1155_v23, 0.0  ;;  %vm590_vm9 = vcmask 1044480   ;;  %v845_v8 = vmov 0  }
 0x1ac   :  { %v288_v46 = vsel %vm287_vm5, %v826_v10, %v284_v28  ;;  %506 = vadd.xlane.f32.xlu2 %v505_v45  ;;  %512 = vadd.xlane.f32.xlu1 %v511_v33  ;;  %v700_v3 = vsel %vm590_vm9, %v914_v25, 0  ;;  %v591_v4 = vsel %vm590_vm9, %v910_v22, 0  ;;  %v615_v5 = vsel %vm590_vm9, %v922_v30, 0  ;;  %v633_v28 = vld [vmem:[%s1463_s2 + $0x10] sm:$0xff] }
 0x1ad   :  { %v293_v36 = vsel %vm290_vm7, %v292_v41, %v288_v46  ;;  %v303_v51 = vsel %vm302_vm6, %v828_v13, %v299_v32  ;;  %318 = vadd.xlane.f32.xlu0 %v317_v37  ;;  %791 = vset.pattern.permute.xlu1 %v845_v8 }
 0x1ae   :  { %v294_v53 = vmul.f32 %v996_v40, %v293_v36  ;;  %v308_v54 = vsel %vm305_vm8, %v307_v44, %v303_v51  ;;  %790 = vset.pattern.permute.xlu0 %v845_v8  ;;  %709 = vmatpush.bf16.msrb.mxu3 %v700_v3 }
 0x1af   :  { %v309_v55 = vmul.f32 %v994_v39, %v308_v54  ;;  %600 = vmatpush.bf16.msrb.mxu0 %v591_v4  ;;  %624 = vmatpush.bf16.msrb.mxu1 %v615_v5  ;;  %v787_v4 = vld [vmem:[%s1464_s3 + $0x30] sm:$0xff] }
 0x1b0   :  { %v1167_v56 = vmul.f32 %v962_v52, %v294_v53  ;;  %792 = vset.pattern.permute.xlu2 %v845_v8 }
 0x1b1   :  { %v1170_v57 = vmul.f32 %v962_v52, %v309_v55  ;;  %v676_v52 = vsel %vm590_vm9, %v912_v24, 0 }
 0x1b2   :  { %v320_v59 = vsel %vm1468_vm1, %v1167_v56, 0.0  ;;  %685 = vmatpush.bf16.msrb.mxu2 %v676_v52 }
 0x1b3   :  { %v323_v61 = vsel %vm216_vm2, %v1170_v57, 0.0 }
 0x1b4   :  { %324 = vadd.xlane.f32.xlu2 %v323_v61  ;;  %321 = vadd.xlane.f32.xlu1 %v320_v59 }
 0x1c1   :  { %637 = vperm.xlu0 %790, %v631_v42  }
 0x1cc   :  { %647 = vperm.xlu2 %792, %v633_v28  }
 0x1cd   :  { %642 = vperm.xlu1 %791, %v632_v9  }
 0x1d5   :  { %722 = vperm.xlu1 %791, %v785_v19  }
 0x1dd   :  { %732 = vperm.xlu1 %791, %v787_v4   ;;  %v786_v4 = vld [vmem:[%s1464_s3 + $0x28] sm:$0x3] }
 0x211   :  { %v316_v58 = vpop.xlane.xlu2 %315 }
 0x212   :  { %v1176_v62 = vadd.f32 1e-13, %v316_v58 }
 0x214   :  { %829 = vrcp.f32 %v1176_v62  ;;  %v341_v30 = vand.u32 2147483648, %v1176_v62  ;;  %v339_v16 = vand.u32 2147483647, %v1176_v62  ;;  %vm335_vm2 = vweird.f32 %v1176_v62 }
 0x216   :  { %v1221_v0 = vor.u32 1.1754944e-38, %v341_v30  ;;  %vm1230_vm11 = vcmp.eq.f32.partialorder %v339_v16, 8.507059e+37  ;;  %v634_v16 = vld [vmem:[%s1463_s2 + $0x18] sm:$0x3] }
 0x217   :  { %v504_v39 = vpop.xlane.xlu1 %503  ;;  %v510_v40 = vpop.xlane.xlu0 %509  ;;  %652 = vperm.xlu2 %792, %v634_v16  }
 0x218   :  { %v1179_v1 = vadd.f32 1e-13, %v504_v39  ;;  %v1181_v2 = vadd.f32 1e-13, %v510_v40 }
 0x21a   :  { %831 = vrcp.f32 %v1179_v1  ;;  %v1191_v6 = vpop.eup %829  ;;  %v529_v20 = vand.u32 2147483648, %v1179_v1  ;;  %v559_v7 = vand.u32 2147483648, %v1181_v2  ;;  %v527_v29 = vand.u32 2147483647, %v1179_v1 }
 0x21b   :  { %833 = vrcp.f32 %v1181_v2  ;;  %v331_v22 = vmul.f32 %v1191_v6, %v1176_v62  ;;  %vm336_vm10 = vweird.f32 %v1191_v6  ;;  %vm523_vm12 = vweird.f32 %v1179_v1 }
 0x21c   :  { %v557_v49 = vand.u32 2147483647, %v1181_v2  ;;  %v1243_v33 = vor.u32 1.1754944e-38, %v529_v20  ;;  %v1245_v37 = vor.u32 1.1754944e-38, %v559_v7  ;;  %vm553_vm14 = vweird.f32 %v1181_v2  ;;  %vm1286_vm7 = vmor %vm335_vm2, %vm336_vm10 }
 0x21d   :  { %v332_v25 = vsub.f32 1.0, %v331_v22  ;;  %vm1263_vm4 = vcmp.eq.f32.partialorder %v527_v29, 8.507059e+37 }
 0x21e   :  { %vm1296_vm8 = vcmp.eq.f32.partialorder %v557_v49, 8.507059e+37 }
 0x21f   :  { %v507_v24 = vpop.xlane.xlu2 %506  ;;  %v513_v10 = vpop.xlane.xlu1 %512  ;;  %v333_v21 = vmul.f32 %v1191_v6, %v332_v25  ;;  %v788_v25 = vld [vmem:[%s1464_s3 + $0x38] sm:$0x3]  ;;  %727 = vperm.xlu2 %792, %v786_v4  }
 0x220   :  { %v1197_v17 = vadd.f32 1e-13, %v507_v24  ;;  %v319_v11 = vpop.xlane.xlu0 %318  ;;  %v1199_v12 = vpop.eup %831  ;;  %v1201_v13 = vadd.f32 1e-13, %v513_v10  ;;  %737 = vperm.xlu0 %790, %v788_v25  }
 0x221   :  { %v1203_v15 = vadd.f32 1e-13, %v319_v11  ;;  %v1205_v63 = vpop.eup %833  ;;  %v519_v18 = vmul.f32 %v1199_v12, %v1179_v1  ;;  %vm524_vm13 = vweird.f32 %v1199_v12  ;;  %v334_v45 = vadd.f32 %v1191_v6, %v333_v21 }
 0x222   :  { %835 = vrcp.f32 %v1197_v17  ;;  %v549_v26 = vmul.f32 %v1205_v63, %v1181_v2  ;;  %v574_v38 = vand.u32 2147483648, %v1201_v13  ;;  %v542_v50 = vand.u32 2147483647, %v1197_v17  ;;  %vm1324_vm0 = vmor %vm523_vm12, %vm524_vm13 }
 0x223   :  { %837 = vrcp.f32 %v1201_v13  ;;  %v520_v27 = vsub.f32 1.0, %v519_v18  ;;  %v544_v34 = vand.u32 2147483648, %v1197_v17  ;;  %vm554_vm15 = vweird.f32 %v1205_v63 }
 0x224   :  { %v550_v31 = vsub.f32 1.0, %v549_v26  ;;  %839 = vrcp.f32 %v1203_v15  ;;  %vm538_vm3 = vweird.f32 %v1197_v17  ;;  %v572_v54 = vand.u32 2147483647, %v1201_v13 }
 0x225   :  { %v521_v41 = vmul.f32 %v1199_v12, %v520_v27  ;;  %v1259_v55 = vor.u32 1.1754944e-38, %v574_v38  ;;  %vm1269_vm5 = vcmp.eq.f32.partialorder %v542_v50, 8.507059e+37  ;;  %v545_v40 = vor.u32 1.1754944e-38, %v544_v34 }
 0x226   :  { %v551_v53 = vmul.f32 %v1205_v63, %v550_v31  ;;  %vm350_vm6 = vweird.f32 %v1203_v15  ;;  %v354_v52 = vand.u32 2147483647, %v1203_v15  ;;  %v356_v24 = vand.u32 2147483648, %v1203_v15 }
 0x227   :  { %v325_v32 = vpop.xlane.xlu2 %324  ;;  %v322_v46 = vpop.xlane.xlu1 %321  ;;  %v522_v9 = vadd.f32 %v1199_v12, %v521_v41  ;;  %v338_v11 = vsel %vm1286_vm7, %v1191_v6, %v334_v45  ;;  %vm1328_vm1 = vcmp.eq.f32.partialorder %v572_v54, 8.507059e+37 }
 0x228   :  { %v1247_v44 = vpop.eup %835  ;;  %v1253_v36 = vadd.f32 1e-13, %v325_v32  ;;  %v1275_v3 = vadd.f32 1e-13, %v322_v46  ;;  %v552_v18 = vadd.f32 %v1205_v63, %v551_v53  ;;  %vm1316_vm7 = vcmp.eq.f32.partialorder %v354_v52, 8.507059e+37 }
 0x229   :  { %v1255_v51 = vpop.eup %837  ;;  %v534_v59 = vmul.f32 %v1247_v44, %v1197_v17  ;;  %vm539_vm2 = vweird.f32 %v1247_v44  ;;  %v357_v31 = vor.u32 1.1754944e-38, %v356_v24  ;;  %v343_v42 = vsel %vm1230_vm11, %v1221_v0, %v338_v11  ;;  %vm1354_vm11 = vmor %vm553_vm14, %vm554_vm15 }
 0x22a   :  { %v564_v58 = vmul.f32 %v1255_v51, %v1201_v13  ;;  %v1280_v5 = vpop.eup %839  ;;  %841 = vrcp.f32 %v1253_v36  ;;  %v371_v20 = vand.u32 2147483648, %v1275_v3  ;;  %vm569_vm10 = vweird.f32 %v1255_v51  ;;  %vm1341_vm12 = vmor %vm538_vm3, %vm539_vm2 }
 0x22b   :  { %v535_v22 = vsub.f32 1.0, %v534_v59  ;;  %v346_v10 = vmul.f32 %v1280_v5, %v1203_v15  ;;  %843 = vrcp.f32 %v1275_v3  ;;  %v384_v38 = vand.u32 2147483647, %v1253_v36 }
 0x22c   :  { %v565_v62 = vsub.f32 1.0, %v564_v58  ;;  %vm351_vm13 = vweird.f32 %v1280_v5  ;;  %v369_v50 = vand.u32 2147483647, %v1275_v3  ;;  %vm380_vm9 = vweird.f32 %v1253_v36 }
 0x22d   :  { %v536_v19 = vmul.f32 %v1247_v44, %v535_v22  ;;  %v347_v6 = vsub.f32 1.0, %v346_v10  ;;  %v344_v43 = vmul.f32 %v343_v42, %v1074_v48  ;;  %vm365_vm3 = vweird.f32 %v1275_v3 }
 0x22e   :  { %v566_v26 = vmul.f32 %v1255_v51, %v565_v62  ;;  %v372_v34 = vor.u32 1.1754944e-38, %v371_v20  ;;  %v386_v28 = vand.u32 2147483648, %v1253_v36  ;;  %v526_v41 = vsel %vm1324_vm0, %v1199_v12, %v522_v9  ;;  %vm352_vm0 = vmor %vm350_vm6, %vm351_vm13 }
 0x22f   :  { %v537_v29 = vadd.f32 %v1247_v44, %v536_v19  ;;  %v348_v49 = vmul.f32 %v1280_v5, %v347_v6  ;;  %v556_v53 = vsel %vm1354_vm11, %v1205_v63, %v552_v18  ;;  %vm1377_vm15 = vcmp.eq.f32.partialorder %v384_v38, 8.507059e+37 }
 0x230   :  { %v842_v0 = vpop.eup %841  ;;  %v567_v2 = vadd.f32 %v1255_v51, %v566_v26  ;;  %v531_v54 = vsel %vm1263_vm4, %v1243_v33, %v526_v41  ;;  %v578_v52 = vpack.c.bf16 %v344_v43, %v344_v43  ;;  %v561_v33 = vsel %vm1296_vm8, %v1245_v37, %v556_v53  ;;  %v648_v43 = vpop.permute.xlu2 %647 }
 0x231   :  { %v541_v48 = vsel %vm1341_vm12, %v1247_v44, %v537_v29  ;;  %v844_v32 = vpop.eup %843  ;;  %v349_v45 = vadd.f32 %v1280_v5, %v348_v49  ;;  %v376_v46 = vmul.f32 %v842_v0, %v1253_v36  ;;  %vm381_vm14 = vweird.f32 %v842_v0 }
 0x232   :  { %v361_v12 = vmul.f32 %v844_v32, %v1275_v3  ;;  %v546_v59 = vsel %vm1269_vm5, %v545_v40, %v541_v48  ;;  %v532_v15 = vmul.f32 %v531_v54, %v1114_v14  ;;  %vm1509_vm4 = vweird.f32 %v1201_v13  ;;  %vm1410_vm8 = vmor %vm380_vm9, %vm381_vm14 }
 0x233   :  { %v377_v63 = vsub.f32 1.0, %v376_v46  ;;  %v353_v58 = vsel %vm352_vm0, %v1280_v5, %v349_v45  ;;  %v547_v61 = vmul.f32 %v546_v59, %v1155_v23  ;;  %vm570_vm5 = vmor %vm1509_vm4, %vm569_vm10  ;;  %v562_v5 = vmul.f32 %v561_v33, %v1117_v60 }
 0x234   :  { %v362_v8 = vsub.f32 1.0, %v361_v12  ;;  %v358_v9 = vsel %vm1316_vm7, %v357_v31, %v353_v58  ;;  %v664_v40 = vpack.c.bf16 %v532_v15, %v532_v15  ;;  %vm366_vm6 = vweird.f32 %v844_v32 }
 0x235   :  { %v378_v14 = vmul.f32 %v842_v0, %v377_v63  ;;  %v359_v39 = vmul.f32 %v358_v9, %v1149_v35  ;;  %v665_v24 = vpack.c.bf16 %v547_v61, %v547_v61  ;;  %v571_v23 = vsel %vm570_vm5, %v1255_v51, %v567_v2  ;;  %vm367_vm2 = vmor %vm365_vm3, %vm366_vm6 }
 0x236   :  { %v363_v22 = vmul.f32 %v844_v32, %v362_v8  ;;  %v670_v37 = vunpack.c.l.b16 %v664_v40  ;;  %v576_v13 = vsel %vm1328_vm1, %v1259_v55, %v571_v23  ;;  %v666_v51 = vpack.c.bf16 %v562_v5, %v562_v5 }
 0x237   :  { %v379_v25 = vadd.f32 %v842_v0, %v378_v14  ;;  %v579_v30 = vpack.c.bf16 %v359_v39, %v359_v39  ;;  %v671_v60 = vunpack.c.l.b16 %v665_v24  ;;  %v577_v10 = vmul.f32 %v576_v13, %v1146_v47 }
 0x238   :  { %v364_v62 = vadd.f32 %v844_v32, %v363_v22  ;;  %v387_v11 = vor.u32 1.1754944e-38, %v386_v28  ;;  %v584_v16 = vunpack.c.l.b16 %v578_v52  ;;  %vm370_vm1 = vcmp.eq.f32.partialorder %v369_v50, 8.507059e+37 }
 0x239   :  { %v585_v18 = vunpack.c.l.b16 %v579_v30  ;;  %v383_v55 = vsel %vm1410_vm8, %v842_v0, %v379_v25  ;;  %v672_v19 = vpack.c.b16 %v671_v60, %v670_v37  ;;  %v667_v36 = vpack.c.bf16 %v577_v10, %v577_v10  ;;  %v638_v0 = vpop.permute.xlu0 %637 }
 0x23a   :  { %v368_v20 = vsel %vm367_vm2, %v844_v32, %v364_v62  ;;  %v388_v7 = vsel %vm1377_vm15, %v387_v11, %v383_v55  ;;  %vm1512_vm9 = vcmask 80896   ;;  %v694_v47 = vunpack.c.l.b16 %v666_v51 }
 0x23b   :  { %v586_v26 = vpack.c.b16 %v585_v18, %v584_v16  ;;  %v373_v6 = vsel %vm370_vm1, %v372_v34, %v368_v20  ;;  %783 = vmatmul.msk.bf16.vlgmr.msrb.gmra.mxu2 %vm1512_vm9, %v672_v19  ;;  %v695_v3 = vunpack.c.l.b16 %v667_v36  ;;  %v389_v27 = vmul.f32 %v388_v7, %v1170_v57  ;;  %vm1513_vm10 = vmmov %vm1512_vm9 }
 0x23c   :  { %v374_v21 = vmul.f32 %v373_v6, %v1167_v56  ;;  %vm1514_vm7 = vmmov %vm1512_vm9  ;;  %vm1516_vm13 = vcmask 523264   ;;  %vm660_vm3 = vcmask 517120  }
 0x23d   :  { %781 = vmatmul.msk.bf16.vlgmr.msrb.gmra.mxu0 %vm1513_vm10, %v586_v26  ;;  %v696_v29 = vpack.c.b16 %v695_v3, %v694_v47  ;;  %v581_v38 = vpack.c.bf16 %v389_v27, %v389_v27  ;;  %vm1515_vm12 = vmmov %vm1514_vm7 }
 0x23e   :  { %v580_v31 = vpack.c.bf16 %v374_v21, %v374_v21  ;;  %vm1517_vm11 = vmmov %vm1516_vm13 }
 0x23f   :  { %784 = vmatmul.msk.bf16.vlgmr.msrb.gmra.mxu3 %vm1514_vm7, %v696_v29  ;;  %v610_v1 = vunpack.c.l.b16 %v581_v38  ;;  %v643_v50 = vpop.permute.xlu1 %642  ;;  %vm1518_vm0 = vmmov %vm1517_vm11 }
 0x240   :  { %v609_v42 = vunpack.c.l.b16 %v580_v31  ;;  %vm1519_vm14 = vmmov %vm1518_vm0 }
 0x242   :  { %v611_v49 = vpack.c.b16 %v610_v1, %v609_v42 }
 0x244   :  { %782 = vmatmul.msk.bf16.vlgmr.msrb.gmra.mxu1 %vm1515_vm12, %v611_v49 }
 0x247   :  { %v723_v17 = vpop.permute.xlu1 %722 }
 0x24f   :  { %v733_v45 = vpop.permute.xlu1 %732 }
 0x271   :  { %v653_v28 = vpop.permute.xlu2 %652 }
 0x279   :  { %v728_v44 = vpop.permute.xlu2 %727 }
 0x292   :  { %v738_v52 = vpop.permute.xlu0 %737 }
 0x2ba   :  { %v602_v34 = vpop.f32.mrf.mxu0 }
 0x2bb   :  { %v655_v56 = vmul.f32 %v638_v0, %v602_v34 }
 0x2bd   :  { %659 = vst.msk [vmem:[%s1465_s6] sm:$0xff] %vm1516_vm13, %v655_v56 }
 0x2be   :  { %v687_v57 = vpop.f32.mrf.mxu2 }
 0x2bf   :  { %v740_v41 = vmul.f32 %v723_v17, %v687_v57 }
 0x2c1   :  { %v626_v48 = vpop.f32.mrf.mxu1  ;;  %744 = vst.msk [vmem:[%s1466_s7] sm:$0xff] %vm1517_vm11, %v740_v41 }
 0x2c2   :  { %v604_v32 = vpop.f32.mrf.mxu0  ;;  %v657_v2 = vmul.f32 %v648_v43, %v626_v48  ;;  %v711_v46 = vpop.f32.mrf.mxu3 }
 0x2c3   :  { %v656_v53 = vmul.f32 %v643_v50, %v604_v32  ;;  %v742_v12 = vmul.f32 %v733_v45, %v711_v46 }
 0x2c4   :  { %662 = vst.msk [vmem:[%s1465_s6 + $0x10] sm:$0xff] %vm1518_vm0, %v657_v2 }
 0x2c5   :  { %661 = vst.msk [vmem:[%s1465_s6 + $0x8] sm:$0x3] %vm660_vm3, %v656_v53 }
 0x2c6   :  { %746 = vst.msk [vmem:[%s1466_s7 + $0x10] sm:$0xff] %vm1519_vm14, %v742_v12  ;;  %v689_v54 = vpop.f32.mrf.mxu2 }
 0x2c7   :  { %v741_v59 = vmul.f32 %v728_v44, %v689_v54 }
 0x2c9   :  { %v628_v63 = vpop.f32.mrf.mxu1  ;;  %745 = vst.msk [vmem:[%s1466_s7 + $0x8] sm:$0x3] %vm660_vm3, %v741_v59 }
 0x2ca   :  { %v658_v58 = vmul.f32 %v653_v28, %v628_v63  ;;  %v713_v15 = vpop.f32.mrf.mxu3 }
 0x2cb   :  { %v743_v4 = vmul.f32 %v738_v52, %v713_v15 }
 0x2cc   :  { %663 = vst.msk [vmem:[%s1465_s6 + $0x18] sm:$0x3] %vm660_vm3, %v658_v58 }
 0x2cd   :  { %747 = vst.msk [vmem:[%s1466_s7 + $0x18] sm:$0x3] %vm660_vm3, %v743_v4 }

// kernel: esim_forward.10
= control target key start
LH: loop header
LB: loop body
LE: loop exit
PB: predicated region body
PF: predicated region fallthrough
CT: control target
= control target key end

     0   :  { %vm80_vm0 = vcmask 523264   ;;  %vm260_vm1 = vcmask 261120   ;;  %s477_s3 = inlined_call_operand.vmem [shape: bf16[64,32], index: 3, kind: input, shape index: {}]   ;;  %s478_s2 = inlined_call_operand.vmem [shape: bf16[64,32], index: 2, kind: input, shape index: {}]   ;;  %s479_s4 = inlined_call_operand.vmem [shape: bf16[64,32], index: 4, kind: input, shape index: {}]   ;;  %s480_s1 = inlined_call_operand.vmem [shape: f32[40,64], index: 1, kind: input, shape index: {}]   ;;  %s481_s0 = inlined_call_operand.vmem [shape: f32[40,64], index: 0, kind: input, shape index: {}]   ;;  %s482_s5 = inlined_call_operand.vmem [shape: f32[1,32], index: 5, kind: input, shape index: {}]   ;;  %s483_s6 = inlined_call_operand.vmem [shape: f32[40,32], index: 6, kind: output, shape index: {}]  }
   0x1   :  { %v334_v0 = vld [vmem:[%s477_s3 + $0x18] sm:$0xff]  ;;  %v333_v3 = vld [vmem:[%s477_s3 + $0x10] sm:$0xff]  ;;  %v332_v6 = vld [vmem:[%s477_s3 + $0x8] sm:$0xff] }
   0x2   :  { %v330_v1 = vld [vmem:[%s478_s2 + $0x18] sm:$0xff]  ;;  %94 = vmatpush.bf16.msra.mxu0 %v334_v0  ;;  %v329_v4 = vld [vmem:[%s478_s2 + $0x10] sm:$0xff]  ;;  %339 = vmatpush.bf16.msra.mxu3 %v334_v0  ;;  %v328_v7 = vld [vmem:[%s478_s2 + $0x8] sm:$0xff] }
   0x3   :  { %v338_v2 = vld [vmem:[%s479_s4 + $0x18] sm:$0xff]  ;;  %150 = vmatpush.bf16.msra.mxu1 %v330_v1  ;;  %v337_v5 = vld [vmem:[%s479_s4 + $0x10] sm:$0xff]  ;;  %v336_v8 = vld [vmem:[%s479_s4 + $0x8] sm:$0xff] }
   0x4   :  { %222 = vmatpush.bf16.msra.mxu2 %v338_v2  ;;  %v29_v9 = vld [vmem:[%s480_s1] sm:$0xff]  ;;  %v30_v10 = vld [vmem:[%s480_s1 + $0x8] sm:$0xff]  ;;  %v31_v18 = vld [vmem:[%s480_s1 + $0x10] sm:$0xff] }
   0x5   :  { %v24_v11 = vld [vmem:[%s481_s0] sm:$0xff]  ;;  %v25_v12 = vld [vmem:[%s481_s0 + $0x8] sm:$0xff]  ;;  %v32_v19 = vld [vmem:[%s480_s1 + $0x18] sm:$0xff]  ;;  %v45_v20 = vpack.c.bf16 %v30_v10, %v29_v9 }
   0x6   :  { %95 = vmatpush.bf16.msra.mxu0 %v333_v3  ;;  %340 = vmatpush.bf16.msra.mxu3 %v333_v3  ;;  %v331_v13 = vld [vmem:[%s477_s3] sm:$0xff]  ;;  %v169_v15 = vmul.f32 %v29_v9, %v24_v11  ;;  %v170_v16 = vmul.f32 %v30_v10, %v25_v12  ;;  %v34_v21 = vpack.c.bf16 %v25_v12, %v24_v11  ;;  %v26_v24 = vld [vmem:[%s481_s0 + $0x10] sm:$0xff]  ;;  %v27_v25 = vld [vmem:[%s481_s0 + $0x18] sm:$0xff] }
   0x7   :  { %151 = vmatpush.bf16.msra.mxu1 %v329_v4  ;;  %v327_v14 = vld [vmem:[%s478_s2] sm:$0xff]  ;;  %v46_v23 = vpack.c.bf16 %v32_v19, %v31_v18  ;;  %v171_v26 = vmul.f32 %v31_v18, %v26_v24  ;;  %v172_v27 = vmul.f32 %v32_v19, %v27_v25  ;;  %v35_v29 = vpack.c.bf16 %v27_v25, %v26_v24 }
   0x8   :  { %223 = vmatpush.bf16.msra.mxu2 %v337_v5  ;;  %v335_v17 = vld [vmem:[%s479_s4] sm:$0xff]  ;;  %v174_v22 = vpack.c.bf16 %v170_v16, %v169_v15 }
   0x9   :  { %v33_v28 = vld [vmem:[%s480_s1 + $0x20] sm:$0xff]  ;;  %v175_v30 = vpack.c.bf16 %v172_v27, %v171_v26 }
   0xa   :  { %96 = vmatpush.bf16.msra.mxu0 %v332_v6  ;;  %341 = vmatpush.bf16.msra.mxu3 %v332_v6  ;;  %v47_v31 = vpack.c.bf16 %v33_v28, %v33_v28  ;;  %v28_v32 = vld [vmem:[%s481_s0 + $0x20] sm:$0xff] }
   0xb   :  { %152 = vmatpush.bf16.msra.mxu1 %v328_v7  ;;  %v173_v33 = vmul.f32 %v33_v28, %v28_v32  ;;  %v36_v34 = vpack.c.bf16 %v28_v32, %v28_v32  ;;  %v343_v39 = vld [vmem:[%s482_s5] ss:$0 sm:$0xff] }
   0xc   :  { %224 = vmatpush.bf16.msra.mxu2 %v336_v8 }
   0xd   :  { %v176_v35 = vpack.c.bf16 %v173_v33, %v173_v33 }
   0xe   :  { %97 = vmatpush.bf16.msra.mxu0 %v331_v13  ;;  %342 = vmatpush.bf16.msra.mxu3 %v331_v13 }
   0xf   :  { %153 = vmatpush.bf16.msra.mxu1 %v327_v14 }
  0x10   :  { %225 = vmatpush.bf16.msra.mxu2 %v335_v17 }
  0x11   :  { %286 = vmatmul.msk.bf16.vlgmr.msra.gmra.mxu0 %vm80_vm0, %v45_v20  ;;  %287 = vmatmul.msk.bf16.vlgmr.msra.gmra.mxu3 %vm80_vm0, %v46_v23 }
  0x12   :  { %305 = vmatmul.msk.bf16.vlgmr.msra.gmra.mxu1 %vm80_vm0, %v34_v21 }
  0x13   :  { %324 = vmatmul.msk.bf16.vlgmr.msra.gmra.mxu2 %vm80_vm0, %v174_v22 }
  0x21   :  { %288 = vmatmul.msk.bf16.gmra.mxu3 %vm80_vm0, %v47_v31 }
  0x22   :  { %306 = vmatmul.msk.bf16.gmra.mxu1 %vm80_vm0, %v35_v29 }
  0x23   :  { %325 = vmatmul.msk.bf16.gmra.mxu2 %vm80_vm0, %v175_v30 }
  0x32   :  { %307 = vmatmul.msk.bf16.gmra.mxu1 %vm80_vm0, %v36_v34 }
  0x33   :  { %326 = vmatmul.msk.bf16.gmra.mxu2 %vm80_vm0, %v176_v35 }
  0x8e   :  { %v99_v37 = vpop.f32.mrf.mxu0 }
  0x8f   :  { %v155_v36 = vpop.f32.mrf.mxu1 }
  0x90   :  { %v156_v38 = vadd.f32 %v155_v36, %v99_v37 }
  0x94   :  { %v104_v41 = vpop.f32.mrf.mxu3 }
  0x96   :  { %v227_v40 = vpop.f32.mrf.mxu2  ;;  %v101_v45 = vpop.f32.mrf.mxu0 }
  0x97   :  { %v241_v42 = vadd.f32 %v227_v40, %v156_v38  ;;  %v157_v43 = vpop.f32.mrf.mxu1 }
  0x98   :  { %v158_v47 = vadd.f32 %v157_v43, %v101_v45 }
  0x99   :  { %v250_v44 = vadd.f32 %v343_v39, %v241_v42 }
  0x9b   :  { %v255_v46 = vmax.f32 %v250_v44, 0.0 }
  0x9c   :  { %v106_v49 = vpop.f32.mrf.mxu3 }
  0x9d   :  { %261 = vst.msk [vmem:[%s483_s6] sm:$0xff] %vm260_vm1, %v255_v46 }
  0x9e   :  { %v229_v48 = vpop.f32.mrf.mxu2 }
  0x9f   :  { %v242_v50 = vadd.f32 %v229_v48, %v158_v47  ;;  %v160_v51 = vpop.f32.mrf.mxu1 }
  0xa0   :  { %v161_v54 = vadd.f32 %v160_v51, %v104_v41 }
  0xa1   :  { %v251_v52 = vadd.f32 %v343_v39, %v242_v50 }
  0xa3   :  { %v256_v53 = vmax.f32 %v251_v52, 0.0 }
  0xa4   :  { %v109_v56 = vpop.f32.mrf.mxu3 }
  0xa5   :  { %262 = vst.msk [vmem:[%s483_s6 + $0x8] sm:$0xff] %vm260_vm1, %v256_v53 }
  0xa6   :  { %v232_v55 = vpop.f32.mrf.mxu2 }
  0xa7   :  { %v243_v57 = vadd.f32 %v232_v55, %v161_v54  ;;  %v162_v58 = vpop.f32.mrf.mxu1 }
  0xa8   :  { %v163_v61 = vadd.f32 %v162_v58, %v106_v49 }
  0xa9   :  { %v252_v59 = vadd.f32 %v343_v39, %v243_v57 }
  0xab   :  { %v257_v60 = vmax.f32 %v252_v59, 0.0 }
  0xac   :  { %v111_v63 = vpop.f32.mrf.mxu3 }
  0xad   :  { %263 = vst.msk [vmem:[%s483_s6 + $0x10] sm:$0xff] %vm260_vm1, %v257_v60 }
  0xae   :  { %v234_v62 = vpop.f32.mrf.mxu2 }
  0xaf   :  { %v244_v0 = vadd.f32 %v234_v62, %v163_v61  ;;  %v165_v1 = vpop.f32.mrf.mxu1 }
  0xb0   :  { %v166_v4 = vadd.f32 %v165_v1, %v109_v56 }
  0xb1   :  { %v253_v2 = vadd.f32 %v343_v39, %v244_v0 }
  0xb3   :  { %v258_v3 = vmax.f32 %v253_v2, 0.0 }
  0xb5   :  { %264 = vst.msk [vmem:[%s483_s6 + $0x18] sm:$0xff] %vm260_vm1, %v258_v3 }
  0xb6   :  { %v237_v5 = vpop.f32.mrf.mxu2 }
  0xb7   :  { %v245_v6 = vadd.f32 %v237_v5, %v166_v4  ;;  %v167_v7 = vpop.f32.mrf.mxu1 }
  0xb9   :  { %v254_v8 = vadd.f32 %v343_v39, %v245_v6 }
  0xbb   :  { %v259_v9 = vmax.f32 %v254_v8, 0.0 }
  0xbd   :  { %265 = vst.msk [vmem:[%s483_s6 + $0x20] sm:$0xff] %vm260_vm1, %v259_v9 }
  0xbe   :  { %v239_v10 = vpop.f32.mrf.mxu2 }

// kernel: esim_forward.13
= control target key start
LH: loop header
LB: loop body
LE: loop exit
PB: predicated region body
PF: predicated region fallthrough
CT: control target
= control target key end

     0   :  { %16 = vsyncpa [#allocation3], 0  ;;  %vm139_vm0 = vcmask 7168   ;;  %vm141_vm1 = vcmask 1024   ;;  %v848_v2 = vmov 0   ;;  %s1221_s0 = inlined_call_operand.vmem [shape: f32[4,10,64], index: 0, kind: input, shape index: {}]   ;;  %s1222_s1 = inlined_call_operand.vmem [shape: f32[4,10,1], index: 1, kind: input, shape index: {}]   ;;  %s1223_s2 = inlined_call_operand.vmem [shape: bf16[64,32], index: 2, kind: input, shape index: {}]   ;;  %s1224_s3 = inlined_call_operand.vmem [shape: bf16[64,32], index: 3, kind: input, shape index: {}]   ;;  %s1225_s4 = inlined_call_operand.vmem [shape: bf16[64,32], index: 4, kind: input, shape index: {}]   ;;  %s1226_s5 = inlined_call_operand.vmem [shape: bf16[64,32], index: 5, kind: input, shape index: {}]   ;;  %s1227_s6 = inlined_call_operand.vmem [shape: f32[1,32], index: 6, kind: input, shape index: {}]   ;;  %s1228_s7 = inlined_call_operand.vmem [shape: bf16[32,3], index: 7, kind: input, shape index: {}]   ;;  %s1229_s8 = inlined_call_operand.vmem [shape: f32[1,3], index: 8, kind: input, shape index: {}]   ;;  %s1230_s9 = inlined_call_operand.hbm [shape: f32[2,3], index: 9, kind: output, shape index: {0}]   ;;  %s1231_s10 = inlined_call_operand.hbm [shape: f32[2,3], index: 10, kind: output, shape index: {1}]  }
   0x1   :  { %v909_v0 = vld [vmem:[%s1222_s1 + $0x30] sm:$0xff]  ;;  %v914_v1 = vld [vmem:[%s1222_s1 + $0x20] sm:$0xff]  ;;  %778 = vset.pattern.permute.xlu1 %v848_v2  ;;  %777 = vset.pattern.permute.xlu0 %v848_v2  ;;  %v930_v6 = vld [vmem:[%s1222_s1 + $0x38] sm:$0x3] }
   0x2   :  { %v168_v3 = vsel %vm139_vm0, %v909_v0, 0.0  ;;  %v159_v4 = vsel %vm139_vm0, %v914_v1, 0.0  ;;  %v925_v5 = vld [vmem:[%s1222_s1 + $0x10] sm:$0xff]  ;;  %v935_v7 = vld [vmem:[%s1222_s1] sm:$0xff]  ;;  %85 = vperm.xlu1 %778, %v909_v0   ;;  %75 = vperm.xlu0 %777, %v914_v1   ;;  %v169_v8 = vsel %vm141_vm1, %v930_v6, 0.0 }
   0x3   :  { %v50_v9 = vld [vmem:[%s1222_s1 + $0x28] sm:$0x3]  ;;  %v140_v11 = vsel %vm139_vm0, %v935_v7, 0.0  ;;  %779 = vset.pattern.permute.xlu2 %v848_v2  ;;  %v150_v12 = vsel %vm139_vm0, %v925_v5, 0.0  ;;  %v170_v13 = vadd.f32 %v169_v8, %v168_v3  ;;  %v48_v16 = vld [vmem:[%s1222_s1 + $0x18] sm:$0x3] }
   0x4   :  { %v947_v10 = vld [vmem:[%s1222_s1 + $0x8] sm:$0x3]  ;;  %v160_v14 = vsel %vm141_vm1, %v50_v9, 0.0  ;;  %65 = vperm.xlu2 %779, %v925_v5   ;;  %v151_v19 = vsel %vm141_vm1, %v48_v16, 0.0 }
   0x5   :  { %v142_v15 = vsel %vm141_vm1, %v947_v10, 0.0  ;;  %v161_v17 = vadd.f32 %v160_v14, %v159_v4  ;;  %v171_v20 = vrot.slane %v170_v13, 4 }
   0x6   :  { %v143_v18 = vadd.f32 %v142_v15, %v140_v11 }
   0x7   :  { %17 = vsyncpa [#allocation5], 0  ;;  %v162_v21 = vrot.slane %v161_v17, 4  ;;  %v152_v23 = vadd.f32 %v151_v19, %v150_v12  ;;  %v172_v24 = vadd.f32 %v171_v20, %v170_v13  ;;  %vm262_vm2 = vcmp.gt.f32.partialorder %v50_v9, 0.0  ;;  %v767_v54 = vld [vmem:[%s1225_s4 + $0x18] sm:$0xff]  ;;  %v766_v56 = vld [vmem:[%s1225_s4 + $0x10] sm:$0xff] }
   0x8   :  { %v144_v22 = vrot.slane %v143_v18, 4  ;;  %vm261_vm3 = vcmp.gt.f32.partialorder %v914_v1, 0.0  ;;  %v270_v45 = vsel %vm262_vm2, 1, %v848_v2  ;;  %vm263_vm4 = vcmp.gt.f32.partialorder %v909_v0, 0.0  ;;  %509 = vmatpush.bf16.msra.mxu2 %v767_v54  ;;  %v765_v57 = vld [vmem:[%s1225_s4 + $0x8] sm:$0xff]  ;;  %v764_v60 = vld [vmem:[%s1225_s4] sm:$0xff] }
   0x9   :  { %v163_v25 = vadd.f32 %v162_v21, %v161_v17  ;;  %v173_v28 = vrot.slane %v172_v24, 2  ;;  %v153_v29 = vrot.slane %v152_v23, 4  ;;  %v269_v46 = vsel %vm261_vm3, 1, %v848_v2  ;;  %v1004_v63 = vld [vmem:[%s1221_s0 + $0x30] sm:$0xff]  ;;  %v1009_v0 = vld [vmem:[%s1221_s0 + $0x20] sm:$0xff]  ;;  %v759_v1 = vld [vmem:[%s1223_s2 + $0x18] sm:$0xff] }
   0xa   :  { %v145_v26 = vadd.f32 %v144_v22, %v143_v18  ;;  %90 = vperm.xlu1 %778, %v930_v6   ;;  %80 = vperm.xlu0 %777, %v50_v9   ;;  %vm257_vm5 = vcmp.gt.f32.partialorder %v935_v7, 0.0  ;;  %vm264_vm6 = vcmp.gt.f32.partialorder %v930_v6, 0.0  ;;  %v271_v47 = vsel %vm263_vm4, 1, %v848_v2  ;;  %v1027_v6 = vld [vmem:[%s1221_s0 + $0x28] sm:$0x3]  ;;  %v758_v12 = vld [vmem:[%s1223_s2 + $0x10] sm:$0xff] }
   0xb   :  { %v164_v27 = vrot.slane %v163_v25, 2  ;;  %v174_v33 = vadd.f32 %v173_v28, %v172_v24  ;;  %v154_v34 = vadd.f32 %v153_v29, %v152_v23  ;;  %v265_v48 = vsel %vm257_vm5, 1, %v848_v2  ;;  %453 = vmatpush.bf16.msra.mxu1 %v759_v1  ;;  %v757_v23 = vld [vmem:[%s1223_s2 + $0x8] sm:$0xff]  ;;  %s850_s17 = smov [#allocation4]   ;;  %s665_s20 = sshll.u32 %s1231_s10, 4  ;;  %s666_s20 = int_to_ptr.hbm [resolvable:$true] %s665_s20 }
   0xc   :  { %v146_v30 = vrot.slane %v145_v26, 2  ;;  %v272_v49 = vsel %vm264_vm6, 1, %v848_v2  ;;  %vm258_vm7 = vcmp.gt.f32.partialorder %v947_v10, 0.0  ;;  %vm260_vm8 = vcmp.gt.f32.partialorder %v48_v16, 0.0  ;;  %510 = vmatpush.bf16.msra.mxu2 %v766_v56  ;;  %v1050_v24 = vld [vmem:[%s1221_s0 + $0x8] sm:$0x3] }
   0xd   :  { %v165_v31 = vadd.f32 %v164_v27, %v163_v25  ;;  %v175_v37 = vrot.slane %v174_v33, 1  ;;  %v155_v39 = vrot.slane %v154_v34, 2  ;;  %vm259_vm9 = vcmp.gt.f32.partialorder %v925_v5, 0.0  ;;  %v1022_v5 = vld [vmem:[%s1221_s0 + $0x38] sm:$0x3]  ;;  %v1055_v27 = vld [vmem:[%s1221_s0] sm:$0xff] }
   0xe   :  { %v147_v35 = vadd.f32 %v146_v30, %v145_v26  ;;  %v266_v50 = vsel %vm258_vm7, 1, %v848_v2  ;;  %v268_v51 = vsel %vm260_vm8, 1, %v848_v2  ;;  %v267_v52 = vsel %vm259_vm9, 1, %v848_v2 }
   0xf   :  { %v166_v32 = vrot.slane %v165_v31, 1  ;;  %v176_v40 = vadd.f32 %v175_v37, %v174_v33  ;;  %v156_v42 = vadd.f32 %v155_v39, %v154_v34  ;;  %vm101_vm10 = vcmask 523264   ;;  %454 = vmatpush.bf16.msra.mxu1 %v758_v12 }
  0x10   :  { %v148_v38 = vrot.slane %v147_v35, 1  ;;  %511 = vmatpush.bf16.msra.mxu2 %v765_v57  ;;  %vm103_vm11 = vcmask 517120   ;;  %vm373_vm5 = vcmask 1041409  }
  0x11   :  { %v167_v36 = vadd.f32 %v166_v32, %v165_v31  ;;  %v157_v43 = vrot.slane %v156_v42, 1 }
  0x12   :  { %60 = vperm.xlu1 %778, %v947_v10   ;;  %55 = vperm.xlu0 %777, %v935_v7   ;;  %v149_v41 = vadd.f32 %v148_v38, %v147_v35  ;;  %v756_v38 = vld [vmem:[%s1223_s2] sm:$0xff]  ;;  %s849_s2 = smov [#allocation2]  }
  0x13   :  { %189 = vperm.xlu2 %779, %v167_v36   ;;  %v158_v44 = vadd.f32 %v157_v43, %v156_v42  ;;  %455 = vmatpush.bf16.msra.mxu1 %v757_v23  ;;  %s652_s16 = sshll.u32 %s849_s2, 4  ;;  %s653_s16 = int_to_ptr.vmem [resolvable:$true] %s652_s16 }
  0x14   :  { %512 = vmatpush.bf16.msra.mxu2 %v764_v60 }
  0x17   :  { %456 = vmatpush.bf16.msra.mxu1 %v756_v38 }
  0x1a   :  { %179 = vperm.xlu1 %778, %v149_v41   ;;  %70 = vperm.xlu0 %777, %v48_v16   ;;  %v1076_v41 = vld [vmem:[%s1221_s0 + $0x10] sm:$0xff] }
  0x1b   :  { %194 = vperm.xlu2 %779, %v176_v40  }
  0x22   :  { %289 = vperm.xlu1 %778, %v270_v45   ;;  %286 = vperm.xlu0 %777, %v269_v46   ;;  %v771_v46 = vld [vmem:[%s1226_s5 + $0x18] sm:$0xff] }
  0x23   :  { %184 = vperm.xlu2 %779, %v158_v44   ;;  %566 = vmatpush.bf16.msra.mxu3 %v771_v46 }
  0x2a   :  { %274 = vperm.xlu1 %778, %v265_v48   ;;  %295 = vperm.xlu0 %777, %v272_v49  }
  0x2b   :  { %292 = vperm.xlu2 %779, %v271_v47  }
  0x32   :  { %283 = vperm.xlu1 %778, %v268_v51   ;;  %280 = vperm.xlu0 %777, %v267_v52  }
  0x33   :  { %277 = vperm.xlu2 %779, %v266_v50  }
  0x5e   :  { %v979_v53 = vpop.permute.xlu2 %65 }
  0x5f   :  { %v95_v57 = vmul.f32 %v979_v53, %v1076_v41 }
  0x6d   :  { %v984_v55 = vpop.permute.xlu2 %189 }
  0x6e   :  { %782 = vrcp.f32 %v984_v55  ;;  %vm232_vm12 = vweird.f32 %v984_v55  ;;  %v236_v32 = vand.u32 2147483647, %v984_v55  ;;  %v238_v39 = vand.u32 2147483648, %v984_v55 }
  0x70   :  { %vm237_vm2 = vcmp.eq.f32.partialorder %v236_v32, 8.507059e+37 }
  0x74   :  { %v86_v59 = vpop.permute.xlu1 %85  ;;  %v76_v61 = vpop.permute.xlu0 %75 }
  0x75   :  { %v993_v58 = vpop.permute.xlu2 %194  ;;  %v999_v62 = vpop.eup %782  ;;  %v99_v4 = vmul.f32 %v86_v59, %v1004_v63  ;;  %v97_v8 = vmul.f32 %v76_v61, %v1009_v0  ;;  %v239_v59 = vor.u32 1.1754944e-38, %v238_v39 }
  0x76   :  { %784 = vrcp.f32 %v993_v58  ;;  %v228_v3 = vmul.f32 %v999_v62, %v984_v55  ;;  %vm233_vm13 = vweird.f32 %v999_v62  ;;  %vm247_vm14 = vweird.f32 %v993_v58 }
  0x77   :  { %v130_v16 = vsel %vm101_vm10, %v99_v4, 0.0  ;;  %v121_v18 = vsel %vm101_vm10, %v97_v8, 0.0  ;;  %vm1092_vm0 = vmor %vm232_vm12, %vm233_vm13  ;;  %v253_v51 = vand.u32 2147483648, %v993_v58  ;;  %v251_v60 = vand.u32 2147483647, %v993_v58 }
  0x78   :  { %v229_v15 = vsub.f32 1.0, %v228_v3 }
  0x79   :  { %vm252_vm3 = vcmp.eq.f32.partialorder %v251_v60, 8.507059e+37 }
  0x7a   :  { %v230_v29 = vmul.f32 %v999_v62, %v229_v15  ;;  %v770_v15 = vld [vmem:[%s1226_s5 + $0x10] sm:$0xff] }
  0x7b   :  { %567 = vmatpush.bf16.msra.mxu3 %v770_v15 }
  0x7c   :  { %v1014_v2 = vpop.eup %784  ;;  %v91_v10 = vpop.permute.xlu1 %90  ;;  %v231_v47 = vadd.f32 %v999_v62, %v230_v29  ;;  %v769_v29 = vld [vmem:[%s1226_s5 + $0x8] sm:$0xff] }
  0x7d   :  { %v243_v7 = vmul.f32 %v1014_v2, %v993_v58  ;;  %v1032_v9 = vpop.permute.xlu2 %184  ;;  %v81_v11 = vpop.permute.xlu0 %80  ;;  %v100_v13 = vmul.f32 %v91_v10, %v1022_v5  ;;  %vm248_vm15 = vweird.f32 %v1014_v2  ;;  %v254_v10 = vor.u32 1.1754944e-38, %v253_v51  ;;  %v761_v51 = vld [vmem:[%s1224_s3 + $0x8] sm:$0xff] }
  0x7e   :  { %786 = vrcp.f32 %v1032_v9  ;;  %v98_v14 = vmul.f32 %v81_v11, %v1027_v6  ;;  %vm1102_vm1 = vmor %vm247_vm14, %vm248_vm15  ;;  %v235_v53 = vsel %vm1092_vm0, %v999_v62, %v231_v47  ;;  %v112_v62 = vsel %vm101_vm10, %v95_v57, 0.0 }
  0x7f   :  { %v244_v17 = vsub.f32 1.0, %v243_v7  ;;  %v131_v19 = vsel %vm103_vm11, %v100_v13, 0.0  ;;  %v1109_v7 = vld [vmem:[%s1221_s0 + $0x18] sm:$0x3]  ;;  %vm217_vm4 = vweird.f32 %v1032_v9  ;;  %568 = vmatpush.bf16.msra.mxu3 %v769_v29 }
  0x80   :  { %v122_v20 = vsel %vm103_vm11, %v98_v14, 0.0  ;;  %v132_v21 = vadd.f32 %v131_v19, %v130_v16 }
  0x81   :  { %v123_v22 = vadd.f32 %v122_v20, %v121_v18  ;;  %v245_v30 = vmul.f32 %v1014_v2, %v244_v17  ;;  %v240_v18 = vsel %vm237_vm2, %v239_v59, %v235_v53 }
  0x82   :  { %v133_v25 = vrot.slane %v132_v21, 4 }
  0x83   :  { %v124_v26 = vrot.slane %v123_v22, 4  ;;  %v246_v48 = vadd.f32 %v1014_v2, %v245_v30  ;;  %v221_v30 = vand.u32 2147483647, %v1032_v9 }
  0x84   :  { %v1057_v28 = vpop.eup %786  ;;  %v61_v31 = vpop.permute.xlu1 %60  ;;  %v134_v33 = vadd.f32 %v133_v25, %v132_v21 }
  0x85   :  { %v125_v34 = vadd.f32 %v124_v26, %v123_v22  ;;  %v1063_v35 = vpop.permute.xlu2 %292  ;;  %v94_v36 = vmul.f32 %v61_v31, %v1050_v24  ;;  %v56_v37 = vpop.permute.xlu0 %55  ;;  %v213_v42 = vmul.f32 %v1057_v28, %v1032_v9  ;;  %v250_v58 = vsel %vm1102_vm1, %v1014_v2, %v246_v48  ;;  %v763_v26 = vld [vmem:[%s1224_s3 + $0x18] sm:$0xff]  ;;  %v762_v48 = vld [vmem:[%s1224_s3 + $0x10] sm:$0xff] }
  0x86   :  { %v93_v40 = vmul.f32 %v56_v37, %v1055_v27  ;;  %v135_v43 = vrot.slane %v134_v33, 2  ;;  %v255_v19 = vsel %vm252_vm3, %v254_v10, %v250_v58  ;;  %vm218_vm7 = vweird.f32 %v1057_v28  ;;  %407 = vmatpush.bf16.msra.mxu0 %v763_v26 }
  0x87   :  { %v126_v44 = vrot.slane %v125_v34, 2  ;;  %v104_v45 = vsel %vm103_vm11, %v94_v36, 0.0  ;;  %v214_v61 = vsub.f32 1.0, %v213_v42  ;;  %vm303_vm8 = vcmp.eq.s32.totalorder %v1063_v35, 1  ;;  %vm1161_vm13 = vmor %vm217_vm4, %vm218_vm7 }
  0x88   :  { %v102_v49 = vsel %vm101_vm10, %v93_v40, 0.0  ;;  %v136_v52 = vadd.f32 %v135_v43, %v134_v33  ;;  %v223_v33 = vand.u32 2147483648, %v1032_v9  ;;  %vm1168_vm15 = vcmp.eq.f32.partialorder %v221_v30, 8.507059e+37 }
  0x89   :  { %v127_v54 = vadd.f32 %v126_v44, %v125_v34  ;;  %v105_v56 = vadd.f32 %v104_v45, %v102_v49  ;;  %v215_v2 = vmul.f32 %v1057_v28, %v214_v61  ;;  %v768_v49 = vld [vmem:[%s1226_s5] sm:$0xff]  ;;  %v311_v9 = vsel %vm303_vm8, %v1004_v63, -10000000.0 }
  0x8a   :  { %v137_v1 = vrot.slane %v136_v52, 1  ;;  %408 = vmatpush.bf16.msra.mxu0 %v762_v48  ;;  %569 = vmatpush.bf16.msra.mxu3 %v768_v49  ;;  %v224_v58 = vor.u32 1.1754944e-38, %v223_v33 }
  0x8b   :  { %v128_v3 = vrot.slane %v127_v54, 1  ;;  %v106_v4 = vrot.slane %v105_v56, 4  ;;  %v216_v37 = vadd.f32 %v1057_v28, %v215_v2 }
  0x8c   :  { %v1117_v8 = vpop.permute.xlu1 %179  ;;  %v138_v11 = vadd.f32 %v137_v1, %v136_v52 }
  0x8d   :  { %v129_v12 = vadd.f32 %v128_v3, %v127_v54  ;;  %v107_v13 = vadd.f32 %v106_v4, %v105_v56  ;;  %v71_v14 = vpop.permute.xlu0 %70  ;;  %788 = vrcp.f32 %v1117_v8  ;;  %v278_v17 = vpop.permute.xlu2 %277  ;;  %v206_v46 = vand.u32 2147483647, %v1117_v8 }
  0x8e   :  { %v96_v16 = vmul.f32 %v71_v14, %v1109_v7  ;;  %v256_v23 = vmul.f32 %v255_v19, %v138_v11  ;;  %vm298_vm6 = vcmp.eq.s32.totalorder %v278_v17, 1  ;;  %v208_v50 = vand.u32 2147483648, %v1117_v8  ;;  %409 = vmatpush.bf16.msra.mxu0 %v761_v51 }
  0x8f   :  { %v108_v20 = vrot.slane %v107_v13, 2  ;;  %v241_v22 = vmul.f32 %v240_v18, %v129_v12  ;;  %v306_v43 = vsel %vm298_vm6, %v1050_v24, -10000000.0  ;;  %v220_v4 = vsel %vm1161_vm13, %v1057_v28, %v216_v37  ;;  %v760_v28 = vld [vmem:[%s1224_s3] sm:$0xff] }
  0x90   :  { %v113_v21 = vsel %vm103_vm11, %v96_v16, 0.0  ;;  %v463_v32 = vpack.c.bf16 %v256_v23, %v256_v23  ;;  %vm202_vm0 = vweird.f32 %v1117_v8  ;;  %v314_v14 = vsel %vm103_vm11, %v306_v43, -inf }
  0x91   :  { %v114_v25 = vadd.f32 %v113_v21, %v112_v62  ;;  %v462_v31 = vpack.c.bf16 %v241_v22, %v241_v22  ;;  %v109_v38 = vadd.f32 %v108_v20, %v107_v13  ;;  %vm207_vm2 = vcmp.eq.f32.partialorder %v206_v46, 8.507059e+37 }
  0x92   :  { %v475_v42 = vunpack.c.l.b16 %v463_v32  ;;  %v209_v35 = vor.u32 1.1754944e-38, %v208_v50  ;;  %v225_v18 = vsel %vm1168_vm15, %v224_v58, %v220_v4  ;;  %410 = vmatpush.bf16.msra.mxu0 %v760_v28  ;;  %v340_v23 = vsel %vm101_vm10, %v311_v9, -inf }
  0x93   :  { %v115_v34 = vrot.slane %v114_v25, 4  ;;  %v789_v36 = vpop.eup %788  ;;  %v474_v40 = vunpack.c.l.b16 %v462_v31  ;;  %v110_v59 = vrot.slane %v109_v38, 1 }
  0x94   :  { %v290_v39 = vpop.permute.xlu1 %289  ;;  %v198_v45 = vmul.f32 %v789_v36, %v1117_v8  ;;  %vm203_vm14 = vweird.f32 %v789_v36 }
  0x95   :  { %v116_v44 = vadd.f32 %v115_v34, %v114_v25  ;;  %v287_v47 = vpop.permute.xlu0 %286  ;;  %vm302_vm12 = vcmp.eq.s32.totalorder %v290_v39, 1  ;;  %v476_v24 = vsel %vm373_vm5, %v475_v42, %v474_v40  ;;  %v111_v13 = vadd.f32 %v110_v59, %v109_v38  ;;  %vm204_vm1 = vmor %vm202_vm0, %vm203_vm14 }
  0x96   :  { %vm301_vm9 = vcmp.eq.s32.totalorder %v287_v47, 1  ;;  %v199_v54 = vsub.f32 1.0, %v198_v45  ;;  %v310_v57 = vsel %vm302_vm12, %v1027_v6, -10000000.0  ;;  %v477_v61 = vpack.c.b16 %v476_v24, %v476_v24 }
  0x97   :  { %v117_v52 = vrot.slane %v116_v44, 2  ;;  %v309_v56 = vsel %vm301_vm9, %v1009_v0, -10000000.0  ;;  %v332_v55 = vsel %vm103_vm11, %v310_v57, -inf }
  0x98   :  { %v331_v60 = vsel %vm101_vm10, %v309_v56, -inf  ;;  %v200_v0 = vmul.f32 %v789_v36, %v199_v54  ;;  %729 = vmatmul.msk.bf16.vlgmr.msra.gmra.mxu2 %vm101_vm10, %v477_v61 }
  0x99   :  { %v118_v3 = vadd.f32 %v117_v52, %v116_v44  ;;  %v333_v6 = vmax.f32 %v331_v60, %v332_v55 }
  0x9a   :  { %v201_v11 = vadd.f32 %v789_v36, %v200_v0 }
  0x9b   :  { %v119_v10 = vrot.slane %v118_v3, 1  ;;  %v334_v12 = vrot.slane %v333_v6, 4 }
  0x9c   :  { %v275_v63 = vpop.permute.xlu1 %274  ;;  %v205_v16 = vsel %vm204_vm1, %v789_v36, %v201_v11 }
  0x9d   :  { %v120_v15 = vadd.f32 %v119_v10, %v118_v3  ;;  %v335_v62 = vmax.f32 %v333_v6, %v334_v12  ;;  %v296_v2 = vpop.permute.xlu0 %295  ;;  %vm297_vm3 = vcmp.eq.s32.totalorder %v275_v63, 1  ;;  %v210_v17 = vsel %vm207_vm2, %v209_v35, %v205_v16  ;;  %v773_v63 = vld [vmem:[%s1228_s7 + $0x8] sm:$0xff] }
  0x9e   :  { %vm304_vm4 = vcmp.eq.s32.totalorder %v296_v2, 1  ;;  %v305_v8 = vsel %vm297_vm3, %v1055_v27, -10000000.0  ;;  %v211_v22 = vmul.f32 %v210_v17, %v111_v13  ;;  %613 = vmatpush.bf16.msrb.mxu0 %v773_v63 }
  0x9f   :  { %v336_v19 = vrot.slane %v335_v62, 2  ;;  %v312_v20 = vsel %vm304_vm4, %v1022_v5, -10000000.0  ;;  %v313_v21 = vsel %vm101_vm10, %v305_v8, -inf  ;;  %v226_v29 = vmul.f32 %v225_v18, %v120_v15 }
  0xa0   :  { %v341_v25 = vsel %vm103_vm11, %v312_v20, -inf  ;;  %v315_v26 = vmax.f32 %v313_v21, %v314_v14  ;;  %v349_v27 = vpack.c.bf16 %v211_v22, %v211_v22  ;;  %v780_v20 = vld [vmem:[%s1227_s6] ss:$0 sm:$0xff] }
  0xa1   :  { %v337_v30 = vmax.f32 %v335_v62, %v336_v19  ;;  %v342_v31 = vmax.f32 %v340_v23, %v341_v25  ;;  %v350_v33 = vpack.c.bf16 %v226_v29, %v226_v29  ;;  %v772_v62 = vld [vmem:[%s1228_s7] sm:$0xff] }
  0xa2   :  { %v316_v32 = vrot.slane %v315_v26, 4  ;;  %v418_v36 = vunpack.c.l.b16 %v349_v27  ;;  %614 = vmatpush.bf16.msrb.mxu0 %v772_v62 }
  0xa3   :  { %v343_v34 = vrot.slane %v342_v31, 4  ;;  %v419_v5 = vunpack.c.l.b16 %v350_v33  ;;  %v338_v39 = vrot.slane %v337_v30, 1 }
  0xa4   :  { %v317_v37 = vmax.f32 %v315_v26, %v316_v32  ;;  %v284_v38 = vpop.permute.xlu1 %283 }
  0xa5   :  { %v344_v40 = vmax.f32 %v342_v31, %v343_v34  ;;  %v281_v42 = vpop.permute.xlu0 %280  ;;  %vm300_vm6 = vcmp.eq.s32.totalorder %v284_v38, 1  ;;  %v420_v45 = vsel %vm373_vm5, %v419_v5, %v418_v36  ;;  %v339_v24 = vmax.f32 %v337_v30, %v338_v39  ;;  %v781_v30 = vld [vmem:[%s1229_s8] ss:$0 sm:$0xff]  ;;  %s654_s8 = sshll.u32 %s1230_s9, 4  ;;  %s663_s9 = sshll.u32 %s850_s17, 4  ;;  %s655_s8 = int_to_ptr.hbm [resolvable:$true] %s654_s8  ;;  %s664_s9 = int_to_ptr.vmem [resolvable:$true] %s663_s9 }
  0xa6   :  { %v318_v43 = vrot.slane %v317_v37, 2  ;;  %vm299_vm7 = vcmp.eq.s32.totalorder %v281_v42, 1  ;;  %v308_v44 = vsel %vm300_vm6, %v1109_v7, -10000000.0  ;;  %v421_v49 = vpack.c.b16 %v420_v45, %v420_v45 }
  0xa7   :  { %v345_v46 = vrot.slane %v344_v40, 2  ;;  %v307_v47 = vsel %vm299_vm7, %v1076_v41, -10000000.0  ;;  %v323_v48 = vsel %vm103_vm11, %v308_v44, -inf  ;;  %v519_v55 = vpack.c.bf16 %v339_v24, %v339_v24 }
  0xa8   :  { %v322_v50 = vsel %vm101_vm10, %v307_v47, -inf  ;;  %v319_v52 = vmax.f32 %v317_v37, %v318_v43  ;;  %712 = vmatmul.msk.bf16.vlgmr.msra.gmra.mxu1 %vm101_vm10, %v421_v49  ;;  %vm620_vm11 = vcmask 17408  }
  0xa9   :  { %v346_v51 = vmax.f32 %v344_v40, %v345_v46  ;;  %v324_v54 = vmax.f32 %v322_v50, %v323_v48  ;;  %v531_v0 = vunpack.c.l.b16 %v519_v55 }
  0xaa   :  { %v320_v7 = vrot.slane %v319_v52, 1 }
  0xab   :  { %v347_v56 = vrot.slane %v346_v51, 1  ;;  %v325_v57 = vrot.slane %v324_v54, 4 }
  0xac   :  { %v321_v41 = vmax.f32 %v319_v52, %v320_v7 }
  0xad   :  { %v348_v59 = vmax.f32 %v346_v51, %v347_v56  ;;  %v326_v60 = vmax.f32 %v324_v54, %v325_v57 }
  0xae   :  { %v359_v10 = vpack.c.bf16 %v321_v41, %v321_v41 }
  0xaf   :  { %v327_v61 = vrot.slane %v326_v60, 2  ;;  %v520_v1 = vpack.c.bf16 %v348_v59, %v348_v59 }
  0xb0   :  { %v371_v12 = vunpack.c.l.b16 %v359_v10 }
  0xb1   :  { %v328_v3 = vmax.f32 %v326_v60, %v327_v61  ;;  %v532_v6 = vunpack.c.l.b16 %v520_v1 }
  0xb3   :  { %v329_v4 = vrot.slane %v328_v3, 1  ;;  %v533_v53 = vsel %vm373_vm5, %v532_v6, %v531_v0 }
  0xb4   :  { %v534_v58 = vpack.c.b16 %v533_v53, %v533_v53 }
  0xb5   :  { %v330_v9 = vmax.f32 %v328_v3, %v329_v4 }
  0xb6   :  { %746 = vmatmul.msk.bf16.vlgmr.msra.gmra.mxu3 %vm101_vm10, %v534_v58 }
  0xb7   :  { %v360_v11 = vpack.c.bf16 %v330_v9, %v330_v9 }
  0xb9   :  { %v372_v28 = vunpack.c.l.b16 %v360_v11 }
  0xbb   :  { %v374_v13 = vsel %vm373_vm5, %v372_v28, %v371_v12 }
  0xbc   :  { %v375_v14 = vpack.c.b16 %v374_v13, %v374_v13 }
  0xbe   :  { %695 = vmatmul.msk.bf16.vlgmr.msra.gmra.mxu0 %vm101_vm10, %v375_v14  ;;  %vm603_vm10 = vcmask 261120  }
 0x11b   :  { %v514_v35 = vpop.f32.mrf.mxu2 }
 0x123   :  { %v516_v15 = vpop.f32.mrf.mxu2 }
 0x125   :  { %v458_v16 = vpop.f32.mrf.mxu1 }
 0x12d   :  { %v460_v2 = vpop.f32.mrf.mxu1 }
 0x139   :  { %v571_v8 = vpop.f32.mrf.mxu3 }
 0x13b   :  { %v412_v17 = vpop.f32.mrf.mxu0 }
 0x13c   :  { %v459_v18 = vadd.f32 %v458_v16, %v412_v17 }
 0x13e   :  { %v518_v19 = vadd.f32 %v514_v35, %v459_v18 }
 0x140   :  { %v575_v21 = vadd.f32 %v571_v8, %v518_v19 }
 0x141   :  { %v573_v22 = vpop.f32.mrf.mxu3 }
 0x142   :  { %v580_v23 = vadd.f32 %v780_v20, %v575_v21 }
 0x143   :  { %v414_v25 = vpop.f32.mrf.mxu0 }
 0x144   :  { %790 = vtanh.f32 %v580_v23 }
 0x14a   :  { %v791_v26 = vpop.eup %790 }
 0x14b   :  { %v582_v29 = vpack.c.bf16 %v791_v26, %v791_v26 }
 0x14d   :  { %755 = vmatmul.msk.bf16.vlgmr.msrb.gmra.mxu0 %vm603_vm10, %v582_v29 }
 0x1ca   :  { %v616_v31 = vpop.f32.mrf.mxu0 }
 0x1cb   :  { %v617_v27 = vadd.f32 %v781_v30, %v616_v31 }
 0x1cd   :  { %v622_v32 = vsel %vm620_vm11, %v617_v27, -inf  ;;  %621 = vst.msk [vmem:[#allocation2] sm:$0x3] %vm620_vm11, %v617_v27 }
 0x1ce   :  { %623 = vmax.xlane.f32.xlu2 %v622_v32  ;;  %657 = dma.vmem_to_hbm [thread:$0]  %s653_s16, 32, %s655_s8, [#allocation3]  }
 0x1d2   :  { %v618_v33 = vpop.f32.mrf.mxu0 }
 0x241   :  { %v624_v34 = vpop.xlane.xlu2 %623 }
 0x242   :  { %v625_v36 = vsub.f32 %v617_v27, %v624_v34 }
 0x244   :  { %v626_v37 = vmul.f32 1.442695, %v625_v36 }
 0x246   :  { %792 = vpow2.f32 %v626_v37 }
 0x24c   :  { %v793_v38 = vpop.eup %792 }
 0x24d   :  { %v628_v5 = vsel %vm620_vm11, %v793_v38, 0.0 }
 0x24e   :  { %629 = vadd.xlane.f32.xlu0 %v628_v5 }
 0x2c1   :  { %v630_v39 = vpop.xlane.xlu0 %629 }
 0x2c2   :  { %794 = vrcp.f32 %v630_v39  ;;  %v642_v44 = vand.u32 2147483648, %v630_v39  ;;  %v640_v46 = vand.u32 2147483647, %v630_v39  ;;  %vm636_vm8 = vweird.f32 %v630_v39 }
 0x2c4   :  { %v643_v48 = vor.u32 1.1754944e-38, %v642_v44  ;;  %vm641_vm12 = vcmp.eq.f32.partialorder %v640_v46, 8.507059e+37 }
 0x2c8   :  { %v795_v40 = vpop.eup %794 }
 0x2c9   :  { %v632_v42 = vmul.f32 %v795_v40, %v630_v39  ;;  %vm637_vm5 = vweird.f32 %v795_v40 }
 0x2ca   :  { %vm638_vm9 = vmor %vm636_vm8, %vm637_vm5 }
 0x2cb   :  { %v633_v43 = vsub.f32 1.0, %v632_v42 }
 0x2cd   :  { %v634_v45 = vmul.f32 %v795_v40, %v633_v43 }
 0x2cf   :  { %v635_v47 = vadd.f32 %v795_v40, %v634_v45 }
 0x2d1   :  { %v639_v49 = vsel %vm638_vm9, %v795_v40, %v635_v47 }
 0x2d2   :  { %v644_v50 = vsel %vm641_vm12, %v643_v48, %v639_v49 }
 0x2d3   :  { %v645_v24 = vmul.f32 %v793_v38, %v644_v50 }
 0x2d5   :  { %646 = vst.msk [vmem:[#allocation4] sm:$0x3] %vm620_vm11, %v645_v24 }
 0x2d6   :  { %668 = dma.vmem_to_hbm [thread:$0]  %s664_s9, 32, %s666_s20, [#allocation5]  }
 0x2d7   :  { %844 = dma.done.wait [#allocation3], 32  }
 0x2d8   :  { %845 = vsyncadd [#allocation3], 4294967264 }
 0x2d9   :  { %846 = dma.done.wait [#allocation5], 32  }
 0x2da   :  { %847 = vsyncadd [#allocation5], 4294967264 }
 0x2db   :  { %677 = vsyncpa [#allocation3], 1 }
 0x2dc   :  { %678 = vsyncpa [#allocation5], 1 }

</bundles_post_ra>
